<compile_context>
chip_gen: v5e
topology: v5e:2x2
jax: 0.10.0
libtpu: 0.0.40
codegen_flags: <defaults>
</compile_context>

<pallas_src>
import functools

import jax
import jax.numpy as jnp
from jax.experimental import pallas as pl
from jax.experimental.pallas import tpu as pltpu


_VMEM_SPEC = pl.BlockSpec(memory_space=pltpu.MemorySpace.VMEM)


# ----------------------------------------------------------------------------
# Fused Pallas kernel: whole GBottleneck forward in one call
# ----------------------------------------------------------------------------
def _gbottleneck_kernel(x_ref, adj_ref, w_ref, b_ref, xout_ref, xhid_ref, *,
                        block_num, activation, matmul_dtype):
    adj = adj_ref[...]                 # (Np, Np)  matmul_dtype, loaded once
    x = x_ref[...]                     # (Np, Fp)  float32

    def layer(x_in, idx, relu):
        # out = (adj @ x) @ W + x @ W_loop + b  ==  concat([adj@x, x]) @ [W;Wl] + b
        xm = x_in.astype(matmul_dtype)
        a = jnp.dot(adj, xm, preferred_element_type=jnp.float32)        # (Np, Fp) f32
        xa = jnp.concatenate([a.astype(matmul_dtype), xm], axis=-1)     # (Np, 2Fp)
        out = jnp.dot(xa, w_ref[idx], preferred_element_type=jnp.float32)
        out = out + b_ref[idx]                                          # f32 epilogue
        if relu:
            out = jnp.maximum(out, 0.0)
        return out

    li = 0
    x = layer(x, li, activation)                       # GBottleneck.conv1 (+relu)
    li += 1
    x_hidden = x
    for _ in range(block_num):                         # statically unrolled
        h = layer(x_hidden, li, activation)            # GResBlock.conv1 (+relu)
        li += 1
        h = layer(h, li, activation)                   # GResBlock.conv2 (+relu)
        li += 1
        x_hidden = (x_hidden + h) * 0.5                # residual average (after relu)
    xhid_ref[...] = x_hidden.astype(xhid_ref.dtype)
    x_out = layer(x_hidden, li, relu=False)            # GBottleneck.conv2 (no relu)
    xout_ref[...] = x_out.astype(xout_ref.dtype)


# ----------------------------------------------------------------------------
# Wrapper: host-side weight stacking / lane padding + single pallas_call
# ----------------------------------------------------------------------------
def _round_up(x, m):
    return (x + m - 1) // m * m


def _layer_param_list(params):
    layers = [params["conv1"]]
    for bp in params["blocks"]:
        layers.append(bp["conv1"])
        layers.append(bp["conv2"])
    layers.append(params["conv2"])
    return layers


def gbottleneck_forward(inputs, adj, params, *, activation=True,
                        matmul_dtype=jnp.bfloat16):
    n, in_dim = inputs.shape
    hidden_dim = params["conv1"]["weight"].shape[1]
    out_dim = params["conv2"]["weight"].shape[1]
    block_num = len(params["blocks"])

    fp = _round_up(max(in_dim, hidden_dim, out_dim), 128)   # lane-dense features
    np_ = _round_up(n, 8)                                   # sublane-aligned rows

    # Stack [W ; W_loop] per layer into one (2*fp, fp) weight, zero-padded so the
    # padded activation lanes stay exactly zero through every layer.
    w_list, b_list = [], []
    for p in _layer_param_list(params):
        fin, fout = p["weight"].shape
        w = jnp.zeros((2 * fp, fp), jnp.float32)
        w = w.at[:fin, :fout].set(p["weight"])               # acts on adj @ x
        w = w.at[fp:fp + fin, :fout].set(p["loop_weight"])   # acts on x
        w_list.append(w.astype(matmul_dtype))
        b_list.append(jnp.zeros((1, fp), jnp.float32).at[0, :fout].set(p["bias"]))
    w_stack = jnp.stack(w_list)              # (L, 2*fp, fp)   matmul_dtype
    b_stack = jnp.stack(b_list)              # (L, 1, fp)      float32

    x_pad = jnp.zeros((np_, fp), jnp.float32).at[:n, :in_dim].set(inputs)
    adj_pad = jnp.zeros((np_, np_), jnp.float32).at[:n, :n].set(adj)
    adj_pad = adj_pad.astype(matmul_dtype)

    kern = functools.partial(_gbottleneck_kernel, block_num=block_num,
                             activation=activation, matmul_dtype=matmul_dtype)
    x_out_p, x_hid_p = pl.pallas_call(
        kern,
        out_shape=(jax.ShapeDtypeStruct((np_, fp), jnp.float32),
                   jax.ShapeDtypeStruct((np_, fp), jnp.float32)),
        in_specs=[_VMEM_SPEC] * 4,
        out_specs=(_VMEM_SPEC, _VMEM_SPEC),
    )(x_pad, adj_pad, w_stack, b_stack)

    return x_out_p[:n, :out_dim], x_hid_p[:n, :hidden_dim]


# ----------------------------------------------------------------------------
# Pure-JAX reference mirroring the kernel math (same association / dtypes)
# ----------------------------------------------------------------------------
def reference_forward(inputs, adj, params, *, activation=True,
                      matmul_dtype=jnp.bfloat16):
    adj_m = adj.astype(matmul_dtype)

    def layer(x, p, relu):
        xm = x.astype(matmul_dtype)
        a = jnp.dot(adj_m, xm, preferred_element_type=jnp.float32)
        out = (jnp.dot(a.astype(matmul_dtype), p["weight"].astype(matmul_dtype),
                       preferred_element_type=jnp.float32)
               + jnp.dot(xm, p["loop_weight"].astype(matmul_dtype),
                         preferred_element_type=jnp.float32)
               + p["bias"][None, :])
        return jnp.maximum(out, 0.0) if relu else out

    x = layer(inputs, params["conv1"], activation)
    x_hidden = x
    for bp in params["blocks"]:
        h = layer(x_hidden, bp["conv1"], activation)
        h = layer(h, bp["conv2"], activation)
        x_hidden = (x_hidden + h) * 0.5
    x_out = layer(x_hidden, params["conv2"], False)
    return x_out, x_hidden


# ----------------------------------------------------------------------------
# Parameter construction (matches the PyTorch module __init__ shapes)
# ----------------------------------------------------------------------------
def xavier_uniform(key, fan_in, fan_out):
    bound = (6.0 / (fan_in + fan_out)) ** 0.5
    return jax.random.uniform(key, (fan_in, fan_out), jnp.float32, -bound, bound)


def make_gconv_params(key, in_features, out_features):
    k1, k2 = jax.random.split(key)
    return {
        "weight": xavier_uniform(k1, in_features, out_features),
        "loop_weight": xavier_uniform(k2, in_features, out_features),
        # PyTorch GConv.reset_parameters never touches bias -> stays zeros.
        "bias": jnp.zeros((out_features,), jnp.float32),
    }


def make_gbottleneck_params(key, block_num, in_dim, hidden_dim, out_dim):
    keys = jax.random.split(key, 2 + 2 * block_num)
    params = {
        "conv1": make_gconv_params(keys[0], in_dim, hidden_dim),
        "conv2": make_gconv_params(keys[1], hidden_dim, out_dim),
        "blocks": [],
    }
    for i in range(block_num):
        params["blocks"].append({
            "conv1": make_gconv_params(keys[2 + 2 * i], hidden_dim, hidden_dim),
            "conv2": make_gconv_params(keys[3 + 2 * i], hidden_dim, hidden_dim),
        })
    return params


# ----------------------------------------------------------------------------
if __name__ == "__main__":
    key = jax.random.PRNGKey(0)
    k_adj, k_x, k_params = jax.random.split(key, 3)

    # Small graph consistent with the module's shapes.
    N = 64
    block_num = 2
    in_dim = 16
    hidden_dim = 32
    out_dim = 8

    # Deterministic dense "sparse" adjacency: random mask, row-normalized.
    raw = jax.random.uniform(k_adj, (N, N), jnp.float32)
    mask = (raw > 0.8).astype(jnp.float32) + jnp.eye(N, dtype=jnp.float32)
    adj = mask / jnp.sum(mask, axis=1, keepdims=True)

    x = jax.random.normal(k_x, (N, in_dim), jnp.float32)
    params = make_gbottleneck_params(k_params, block_num, in_dim, hidden_dim,
                                     out_dim)

    fwd = jax.jit(functools.partial(gbottleneck_forward, activation=True))
    x_out, x_hidden = fwd(x, adj, params)
    jax.block_until_ready((x_out, x_hidden))

    assert x_out.shape == (N, out_dim)
    assert x_hidden.shape == (N, hidden_dim)
    assert bool(jnp.all(jnp.isfinite(x_out)))
    assert bool(jnp.all(jnp.isfinite(x_hidden)))

    ref_out, ref_hidden = reference_forward(x, adj, params, activation=True)
    assert bool(jnp.allclose(x_out, ref_out, rtol=1e-2, atol=1e-2))
    assert bool(jnp.allclose(x_hidden, ref_hidden, rtol=1e-2, atol=1e-2))

    print("KERNEL_OK")
</pallas_src>

<mosaic_0001>
module attributes {stable_mosaic.version = 11 : i64} {
  func.func @_gbottleneck_kernel(%arg0: memref<64x128xf32, #tpu.memory_space<vmem>>, %arg1: memref<64x64xbf16, #tpu.memory_space<vmem>>, %arg2: memref<6x256x128xbf16, #tpu.memory_space<vmem>>, %arg3: memref<6x1x128xf32, #tpu.memory_space<vmem>>, %arg4: memref<64x128xf32, #tpu.memory_space<vmem>>, %arg5: memref<64x128xf32, #tpu.memory_space<vmem>>) attributes {dimension_semantics = [], scalar_prefetch = 0 : i64, scratch_operands = 0 : i64, tpu.core_type = #tpu.core_type<tc>} {
    %c0 = arith.constant 0 : index
    %c0_0 = arith.constant 0 : index
    %0 = vector.load %arg1[%c0, %c0_0] : memref<64x64xbf16, #tpu.memory_space<vmem>>, vector<64x64xbf16>
    %c0_1 = arith.constant 0 : index
    %c0_2 = arith.constant 0 : index
    %1 = vector.load %arg0[%c0_1, %c0_2] : memref<64x128xf32, #tpu.memory_space<vmem>>, vector<64x128xf32>
    %2 = arith.truncf %1 : vector<64x128xf32> to vector<64x128xbf16>
    %cst = arith.constant dense<0.000000e+00> : vector<64x128xf32>
    %3 = tpu.matmul %0, %2, %cst {dimension_numbers = #tpu.dot_dimension_numbers<[1], [0], [0], [1], [0, 0, 1, 1], [], []>} : vector<64x64xbf16>, vector<64x128xbf16>, vector<64x128xf32> -> vector<64x128xf32>
    %4 = arith.truncf %3 : vector<64x128xf32> to vector<64x128xbf16>
    %5 = tpu.concatenate %4, %2 in 1 : vector<64x128xbf16>, vector<64x128xbf16> -> vector<64x256xbf16>
    %c0_3 = arith.constant 0 : index
    %c0_4 = arith.constant 0 : index
    %c0_5 = arith.constant 0 : index
    %6 = vector.load %arg2[%c0_3, %c0_4, %c0_5] : memref<6x256x128xbf16, #tpu.memory_space<vmem>>, vector<1x256x128xbf16>
    %7 = vector.shape_cast %6 : vector<1x256x128xbf16> to vector<256x128xbf16>
    %cst_6 = arith.constant dense<0.000000e+00> : vector<64x128xf32>
    %8 = tpu.matmul %5, %7, %cst_6 {dimension_numbers = #tpu.dot_dimension_numbers<[1], [0], [0], [1], [0, 0, 1, 1], [], []>} : vector<64x256xbf16>, vector<256x128xbf16>, vector<64x128xf32> -> vector<64x128xf32>
    %c0_7 = arith.constant 0 : index
    %c0_8 = arith.constant 0 : index
    %c0_9 = arith.constant 0 : index
    %9 = vector.load %arg3[%c0_7, %c0_8, %c0_9] : memref<6x1x128xf32, #tpu.memory_space<vmem>>, vector<1x1x128xf32>
    %10 = vector.shape_cast %9 : vector<1x1x128xf32> to vector<1x128xf32>
    %11 = vector.broadcast %10 : vector<1x128xf32> to vector<64x128xf32>
    %12 = arith.addf %8, %11 : vector<64x128xf32>
    %cst_10 = arith.constant 0.000000e+00 : f32
    %13 = vector.broadcast %cst_10 : f32 to vector<64x128xf32>
    %14 = arith.maximumf %12, %13 : vector<64x128xf32>
    %15 = arith.truncf %14 : vector<64x128xf32> to vector<64x128xbf16>
    %cst_11 = arith.constant dense<0.000000e+00> : vector<64x128xf32>
    %16 = tpu.matmul %0, %15, %cst_11 {dimension_numbers = #tpu.dot_dimension_numbers<[1], [0], [0], [1], [0, 0, 1, 1], [], []>} : vector<64x64xbf16>, vector<64x128xbf16>, vector<64x128xf32> -> vector<64x128xf32>
    %17 = arith.truncf %16 : vector<64x128xf32> to vector<64x128xbf16>
    %18 = tpu.concatenate %17, %15 in 1 : vector<64x128xbf16>, vector<64x128xbf16> -> vector<64x256xbf16>
    %c1 = arith.constant 1 : index
    %c0_12 = arith.constant 0 : index
    %c0_13 = arith.constant 0 : index
    %19 = vector.load %arg2[%c1, %c0_12, %c0_13] : memref<6x256x128xbf16, #tpu.memory_space<vmem>>, vector<1x256x128xbf16>
    %20 = vector.shape_cast %19 : vector<1x256x128xbf16> to vector<256x128xbf16>
    %cst_14 = arith.constant dense<0.000000e+00> : vector<64x128xf32>
    %21 = tpu.matmul %18, %20, %cst_14 {dimension_numbers = #tpu.dot_dimension_numbers<[1], [0], [0], [1], [0, 0, 1, 1], [], []>} : vector<64x256xbf16>, vector<256x128xbf16>, vector<64x128xf32> -> vector<64x128xf32>
    %c1_15 = arith.constant 1 : index
    %c0_16 = arith.constant 0 : index
    %c0_17 = arith.constant 0 : index
    %22 = vector.load %arg3[%c1_15, %c0_16, %c0_17] : memref<6x1x128xf32, #tpu.memory_space<vmem>>, vector<1x1x128xf32>
    %23 = vector.shape_cast %22 : vector<1x1x128xf32> to vector<1x128xf32>
    %24 = vector.broadcast %23 : vector<1x128xf32> to vector<64x128xf32>
    %25 = arith.addf %21, %24 : vector<64x128xf32>
    %cst_18 = arith.constant 0.000000e+00 : f32
    %26 = vector.broadcast %cst_18 : f32 to vector<64x128xf32>
    %27 = arith.maximumf %25, %26 : vector<64x128xf32>
    %28 = arith.truncf %27 : vector<64x128xf32> to vector<64x128xbf16>
    %cst_19 = arith.constant dense<0.000000e+00> : vector<64x128xf32>
    %29 = tpu.matmul %0, %28, %cst_19 {dimension_numbers = #tpu.dot_dimension_numbers<[1], [0], [0], [1], [0, 0, 1, 1], [], []>} : vector<64x64xbf16>, vector<64x128xbf16>, vector<64x128xf32> -> vector<64x128xf32>
    %30 = arith.truncf %29 : vector<64x128xf32> to vector<64x128xbf16>
    %31 = tpu.concatenate %30, %28 in 1 : vector<64x128xbf16>, vector<64x128xbf16> -> vector<64x256xbf16>
    %c2 = arith.constant 2 : index
    %c0_20 = arith.constant 0 : index
    %c0_21 = arith.constant 0 : index
    %32 = vector.load %arg2[%c2, %c0_20, %c0_21] : memref<6x256x128xbf16, #tpu.memory_space<vmem>>, vector<1x256x128xbf16>
    %33 = vector.shape_cast %32 : vector<1x256x128xbf16> to vector<256x128xbf16>
    %cst_22 = arith.constant dense<0.000000e+00> : vector<64x128xf32>
    %34 = tpu.matmul %31, %33, %cst_22 {dimension_numbers = #tpu.dot_dimension_numbers<[1], [0], [0], [1], [0, 0, 1, 1], [], []>} : vector<64x256xbf16>, vector<256x128xbf16>, vector<64x128xf32> -> vector<64x128xf32>
    %c2_23 = arith.constant 2 : index
    %c0_24 = arith.constant 0 : index
    %c0_25 = arith.constant 0 : index
    %35 = vector.load %arg3[%c2_23, %c0_24, %c0_25] : memref<6x1x128xf32, #tpu.memory_space<vmem>>, vector<1x1x128xf32>
    %36 = vector.shape_cast %35 : vector<1x1x128xf32> to vector<1x128xf32>
    %37 = vector.broadcast %36 : vector<1x128xf32> to vector<64x128xf32>
    %38 = arith.addf %34, %37 : vector<64x128xf32>
    %cst_26 = arith.constant 0.000000e+00 : f32
    %39 = vector.broadcast %cst_26 : f32 to vector<64x128xf32>
    %40 = arith.maximumf %38, %39 : vector<64x128xf32>
    %41 = arith.addf %14, %40 : vector<64x128xf32>
    %cst_27 = arith.constant 5.000000e-01 : f32
    %42 = vector.broadcast %cst_27 : f32 to vector<64x128xf32>
    %43 = arith.mulf %41, %42 : vector<64x128xf32>
    %44 = arith.truncf %43 : vector<64x128xf32> to vector<64x128xbf16>
    %cst_28 = arith.constant dense<0.000000e+00> : vector<64x128xf32>
    %45 = tpu.matmul %0, %44, %cst_28 {dimension_numbers = #tpu.dot_dimension_numbers<[1], [0], [0], [1], [0, 0, 1, 1], [], []>} : vector<64x64xbf16>, vector<64x128xbf16>, vector<64x128xf32> -> vector<64x128xf32>
    %46 = arith.truncf %45 : vector<64x128xf32> to vector<64x128xbf16>
    %47 = tpu.concatenate %46, %44 in 1 : vector<64x128xbf16>, vector<64x128xbf16> -> vector<64x256xbf16>
    %c3 = arith.constant 3 : index
    %c0_29 = arith.constant 0 : index
    %c0_30 = arith.constant 0 : index
    %48 = vector.load %arg2[%c3, %c0_29, %c0_30] : memref<6x256x128xbf16, #tpu.memory_space<vmem>>, vector<1x256x128xbf16>
    %49 = vector.shape_cast %48 : vector<1x256x128xbf16> to vector<256x128xbf16>
    %cst_31 = arith.constant dense<0.000000e+00> : vector<64x128xf32>
    %50 = tpu.matmul %47, %49, %cst_31 {dimension_numbers = #tpu.dot_dimension_numbers<[1], [0], [0], [1], [0, 0, 1, 1], [], []>} : vector<64x256xbf16>, vector<256x128xbf16>, vector<64x128xf32> -> vector<64x128xf32>
    %c3_32 = arith.constant 3 : index
    %c0_33 = arith.constant 0 : index
    %c0_34 = arith.constant 0 : index
    %51 = vector.load %arg3[%c3_32, %c0_33, %c0_34] : memref<6x1x128xf32, #tpu.memory_space<vmem>>, vector<1x1x128xf32>
    %52 = vector.shape_cast %51 : vector<1x1x128xf32> to vector<1x128xf32>
    %53 = vector.broadcast %52 : vector<1x128xf32> to vector<64x128xf32>
    %54 = arith.addf %50, %53 : vector<64x128xf32>
    %cst_35 = arith.constant 0.000000e+00 : f32
    %55 = vector.broadcast %cst_35 : f32 to vector<64x128xf32>
    %56 = arith.maximumf %54, %55 : vector<64x128xf32>
    %57 = arith.truncf %56 : vector<64x128xf32> to vector<64x128xbf16>
    %cst_36 = arith.constant dense<0.000000e+00> : vector<64x128xf32>
    %58 = tpu.matmul %0, %57, %cst_36 {dimension_numbers = #tpu.dot_dimension_numbers<[1], [0], [0], [1], [0, 0, 1, 1], [], []>} : vector<64x64xbf16>, vector<64x128xbf16>, vector<64x128xf32> -> vector<64x128xf32>
    %59 = arith.truncf %58 : vector<64x128xf32> to vector<64x128xbf16>
    %60 = tpu.concatenate %59, %57 in 1 : vector<64x128xbf16>, vector<64x128xbf16> -> vector<64x256xbf16>
    %c4 = arith.constant 4 : index
    %c0_37 = arith.constant 0 : index
    %c0_38 = arith.constant 0 : index
    %61 = vector.load %arg2[%c4, %c0_37, %c0_38] : memref<6x256x128xbf16, #tpu.memory_space<vmem>>, vector<1x256x128xbf16>
    %62 = vector.shape_cast %61 : vector<1x256x128xbf16> to vector<256x128xbf16>
    %cst_39 = arith.constant dense<0.000000e+00> : vector<64x128xf32>
    %63 = tpu.matmul %60, %62, %cst_39 {dimension_numbers = #tpu.dot_dimension_numbers<[1], [0], [0], [1], [0, 0, 1, 1], [], []>} : vector<64x256xbf16>, vector<256x128xbf16>, vector<64x128xf32> -> vector<64x128xf32>
    %c4_40 = arith.constant 4 : index
    %c0_41 = arith.constant 0 : index
    %c0_42 = arith.constant 0 : index
    %64 = vector.load %arg3[%c4_40, %c0_41, %c0_42] : memref<6x1x128xf32, #tpu.memory_space<vmem>>, vector<1x1x128xf32>
    %65 = vector.shape_cast %64 : vector<1x1x128xf32> to vector<1x128xf32>
    %66 = vector.broadcast %65 : vector<1x128xf32> to vector<64x128xf32>
    %67 = arith.addf %63, %66 : vector<64x128xf32>
    %cst_43 = arith.constant 0.000000e+00 : f32
    %68 = vector.broadcast %cst_43 : f32 to vector<64x128xf32>
    %69 = arith.maximumf %67, %68 : vector<64x128xf32>
    %70 = arith.addf %43, %69 : vector<64x128xf32>
    %cst_44 = arith.constant 5.000000e-01 : f32
    %71 = vector.broadcast %cst_44 : f32 to vector<64x128xf32>
    %72 = arith.mulf %70, %71 : vector<64x128xf32>
    %c0_45 = arith.constant 0 : index
    %c0_46 = arith.constant 0 : index
    %73 = vector.load %arg5[%c0_45, %c0_46] : memref<64x128xf32, #tpu.memory_space<vmem>>, vector<64x128xf32>
    tpu.vector_store %arg5[%c0_45, %c0_46], %72 {strides = array<i32>} : memref<64x128xf32, #tpu.memory_space<vmem>>, vector<64x128xf32>,
    %74 = arith.truncf %72 : vector<64x128xf32> to vector<64x128xbf16>
    %cst_47 = arith.constant dense<0.000000e+00> : vector<64x128xf32>
    %75 = tpu.matmul %0, %74, %cst_47 {dimension_numbers = #tpu.dot_dimension_numbers<[1], [0], [0], [1], [0, 0, 1, 1], [], []>} : vector<64x64xbf16>, vector<64x128xbf16>, vector<64x128xf32> -> vector<64x128xf32>
    %76 = arith.truncf %75 : vector<64x128xf32> to vector<64x128xbf16>
    %77 = tpu.concatenate %76, %74 in 1 : vector<64x128xbf16>, vector<64x128xbf16> -> vector<64x256xbf16>
    %c5 = arith.constant 5 : index
    %c0_48 = arith.constant 0 : index
    %c0_49 = arith.constant 0 : index
    %78 = vector.load %arg2[%c5, %c0_48, %c0_49] : memref<6x256x128xbf16, #tpu.memory_space<vmem>>, vector<1x256x128xbf16>
    %79 = vector.shape_cast %78 : vector<1x256x128xbf16> to vector<256x128xbf16>
    %cst_50 = arith.constant dense<0.000000e+00> : vector<64x128xf32>
    %80 = tpu.matmul %77, %79, %cst_50 {dimension_numbers = #tpu.dot_dimension_numbers<[1], [0], [0], [1], [0, 0, 1, 1], [], []>} : vector<64x256xbf16>, vector<256x128xbf16>, vector<64x128xf32> -> vector<64x128xf32>
    %c5_51 = arith.constant 5 : index
    %c0_52 = arith.constant 0 : index
    %c0_53 = arith.constant 0 : index
    %81 = vector.load %arg3[%c5_51, %c0_52, %c0_53] : memref<6x1x128xf32, #tpu.memory_space<vmem>>, vector<1x1x128xf32>
    %82 = vector.shape_cast %81 : vector<1x1x128xf32> to vector<1x128xf32>
    %83 = vector.broadcast %82 : vector<1x128xf32> to vector<64x128xf32>
    %84 = arith.addf %80, %83 : vector<64x128xf32>
    %c0_54 = arith.constant 0 : index
    %c0_55 = arith.constant 0 : index
    %85 = vector.load %arg4[%c0_54, %c0_55] : memref<64x128xf32, #tpu.memory_space<vmem>>, vector<64x128xf32>
    tpu.vector_store %arg4[%c0_54, %c0_55], %84 {strides = array<i32>} : memref<64x128xf32, #tpu.memory_space<vmem>>, vector<64x128xf32>,
    return
  }
}

</mosaic_0001>

<bundles_post_ra>
// kernel: gbottleneck_forward.1
= control target key start
LH: loop header
LB: loop body
LE: loop exit
PB: predicated region body
PF: predicated region fallthrough
CT: control target
= control target key end

     0   :  { %vm88_vm0 = vcmask 523264   ;;  %s3185_s0 = inlined_call_operand.vmem [shape: f32[64,128], index: 0, kind: input, shape index: {}]   ;;  %s3186_s2 = inlined_call_operand.vmem [shape: bf16[6,256,128], index: 2, kind: input, shape index: {}]   ;;  %s3187_s1 = inlined_call_operand.vmem [shape: bf16[64,64], index: 1, kind: input, shape index: {}]   ;;  %s3188_s3 = inlined_call_operand.vmem [shape: f32[6,1,128], index: 3, kind: input, shape index: {}]   ;;  %s3189_s5 = inlined_call_operand.vmem [shape: f32[64,128], index: 5, kind: output, shape index: {1}]   ;;  %s3190_s4 = inlined_call_operand.vmem [shape: f32[64,128], index: 4, kind: output, shape index: {0}]  }
   0x1   :  { %v34_v0 = vld [vmem:[%s3185_s0 + $0x30] sm:$0xff]  ;;  %v35_v1 = vld [vmem:[%s3185_s0 + $0x38] sm:$0xff]  ;;  %v32_v2 = vld [vmem:[%s3185_s0 + $0x20] sm:$0xff] }
   0x2   :  { %v42_v3 = vpack.c.bf16 %v34_v0, %v34_v0  ;;  %v43_v4 = vpack.c.bf16 %v35_v1, %v35_v1  ;;  %v33_v5 = vld [vmem:[%s3185_s0 + $0x28] sm:$0xff]  ;;  %v40_v6 = vpack.c.bf16 %v32_v2, %v32_v2  ;;  %v30_v7 = vld [vmem:[%s3185_s0 + $0x10] sm:$0xff]  ;;  %v31_v8 = vld [vmem:[%s3185_s0 + $0x18] sm:$0xff] }
   0x3   :  { %v41_v9 = vpack.c.bf16 %v33_v5, %v33_v5  ;;  %v38_v10 = vpack.c.bf16 %v30_v7, %v30_v7  ;;  %v39_v14 = vpack.c.bf16 %v31_v8, %v31_v8  ;;  %v28_v15 = vld [vmem:[%s3185_s0] sm:$0xff]  ;;  %v29_v17 = vld [vmem:[%s3185_s0 + $0x8] sm:$0xff]  ;;  %v2481_v20 = vld [vmem:[%s3186_s2 + $0x78] sm:$0xff] }
   0x4   :  { %v78_v11 = vunpack.c.l.b16 %v42_v3  ;;  %v79_v12 = vunpack.c.l.b16 %v43_v4  ;;  %v76_v13 = vunpack.c.l.b16 %v40_v6  ;;  %v36_v19 = vpack.c.bf16 %v28_v15, %v28_v15  ;;  %323 = vmatpush.bf16.msra.mxu2 %v2481_v20  ;;  %v2480_v25 = vld [vmem:[%s3186_s2 + $0x70] sm:$0xff]  ;;  %v2479_v29 = vld [vmem:[%s3186_s2 + $0x68] sm:$0xff]  ;;  %v2473_v31 = vld [vmem:[%s3186_s2 + $0x38] sm:$0xff] }
   0x5   :  { %v77_v16 = vunpack.c.l.b16 %v41_v9  ;;  %v74_v22 = vunpack.c.l.b16 %v38_v10  ;;  %v75_v23 = vunpack.c.l.b16 %v39_v14  ;;  %v37_v24 = vpack.c.bf16 %v29_v17, %v29_v17  ;;  %v2478_v32 = vld [vmem:[%s3186_s2 + $0x60] sm:$0xff]  ;;  %v2661_v34 = vld [vmem:[%s3187_s1 + $0x10] sm:$0xff]  ;;  %v2477_v36 = vld [vmem:[%s3186_s2 + $0x58] sm:$0xff] }
   0x6   :  { %v2634_v18 = vpack.c.b16 %v79_v12, %v78_v11  ;;  %v72_v27 = vunpack.c.l.b16 %v36_v19  ;;  %v2656_v33 = vld [vmem:[%s3187_s1] sm:$0xff]  ;;  %v2472_v35 = vld [vmem:[%s3186_s2 + $0x30] sm:$0xff]  ;;  %v2471_v37 = vld [vmem:[%s3186_s2 + $0x28] sm:$0xff] }
   0x7   :  { %v82_v21 = vpack.c.b16 %v77_v16, %v76_v13  ;;  %v81_v26 = vpack.c.b16 %v75_v23, %v74_v22  ;;  %v73_v28 = vunpack.c.l.b16 %v37_v24  ;;  %v2476_v38 = vld [vmem:[%s3186_s2 + $0x50] sm:$0xff]  ;;  %v2470_v39 = vld [vmem:[%s3186_s2 + $0x20] sm:$0xff]  ;;  %v2475_v40 = vld [vmem:[%s3186_s2 + $0x48] sm:$0xff] }
   0x8   :  { %105 = vmatpush.bf16.msra.mxu0 %v2634_v18  ;;  %2562 = vmatpush.bf16.msra.mxu1 %v2634_v18  ;;  %v2688_v41 = vld [vmem:[%s3187_s1 + $0x8] sm:$0xff]  ;;  %v2693_v42 = vld [vmem:[%s3187_s1 + $0x18] sm:$0xff]  ;;  %v2474_v44 = vld [vmem:[%s3186_s2 + $0x40] sm:$0xff] }
   0x9   :  { %324 = vmatpush.bf16.msra.mxu2 %v2480_v25  ;;  %v80_v30 = vpack.c.b16 %v73_v28, %v72_v27  ;;  %v2469_v43 = vld [vmem:[%s3186_s2 + $0x18] sm:$0xff]  ;;  %v2468_v45 = vld [vmem:[%s3186_s2 + $0x10] sm:$0xff]  ;;  %v2467_v46 = vld [vmem:[%s3186_s2 + $0x8] sm:$0xff] }
   0xa   :  { %v2466_v47 = vld [vmem:[%s3186_s2] sm:$0xff] }
   0xb   :  { %v2570_v13 = vld [vmem:[%s3188_s3] ss:$0 sm:$0xff] }
   0xc   :  { %106 = vmatpush.bf16.msra.mxu0 %v82_v21  ;;  %2563 = vmatpush.bf16.msra.mxu1 %v82_v21 }
   0xd   :  { %325 = vmatpush.bf16.msra.mxu2 %v2479_v29 }
  0x10   :  { %107 = vmatpush.bf16.msra.mxu0 %v81_v26  ;;  %2564 = vmatpush.bf16.msra.mxu1 %v81_v26 }
  0x11   :  { %326 = vmatpush.bf16.msra.mxu2 %v2478_v32 }
  0x14   :  { %108 = vmatpush.bf16.msra.mxu0 %v80_v30  ;;  %2565 = vmatpush.bf16.msra.mxu1 %v80_v30 }
  0x15   :  { %327 = vmatpush.bf16.msra.mxu2 %v2477_v36 }
  0x17   :  { %1889 = vmatmul.msk.bf16.vlgmr.msra.gmra.mxu0 %vm88_vm0, %v2656_v33  ;;  %1891 = vmatmul.msk.bf16.vlgmr.msra.gmra.mxu1 %vm88_vm0, %v2661_v34 }
  0x18   :  { %294 = vmatpush.bf16.msrb.mxu1 %v2473_v31 }
  0x19   :  { %328 = vmatpush.bf16.msra.mxu2 %v2476_v38 }
  0x1c   :  { %295 = vmatpush.bf16.msrb.mxu1 %v2472_v35 }
  0x1d   :  { %329 = vmatpush.bf16.msra.mxu2 %v2475_v40 }
  0x20   :  { %296 = vmatpush.bf16.msrb.mxu1 %v2471_v37 }
  0x21   :  { %330 = vmatpush.bf16.msra.mxu2 %v2474_v44 }
  0x24   :  { %297 = vmatpush.bf16.msrb.mxu1 %v2470_v39  ;;  %331 = vmatmul.bf16.vlgmr.msra.gmra.mxu2 %v80_v30 }
  0x27   :  { %1890 = vmatmul.msk.bf16.gmra.mxu0 %vm88_vm0, %v2688_v41  ;;  %1892 = vmatmul.msk.bf16.gmra.mxu1 %vm88_vm0, %v2693_v42 }
  0x28   :  { %298 = vmatpush.bf16.msrb.mxu1 %v2469_v43 }
  0x2c   :  { %299 = vmatpush.bf16.msrb.mxu1 %v2468_v45 }
  0x30   :  { %300 = vmatpush.bf16.msrb.mxu1 %v2467_v46 }
  0x34   :  { %301 = vmatpush.bf16.msrb.mxu1 %v2466_v47  ;;  %336 = vmatmul.bf16.gmra.mxu2 %v81_v26 }
  0x44   :  { %341 = vmatmul.bf16.gmra.mxu2 %v82_v21 }
  0x54   :  { %346 = vmatmul.bf16.gmra.mxu2 %v2634_v18 }
  0x94   :  { %v110_v48 = vpop.f32.mrf.mxu0  ;;  %v120_v56 = vpop.f32.mrf.mxu1 }
  0x95   :  { %v130_v49 = vpack.c.bf16 %v110_v48, %v110_v48  ;;  %v134_v0 = vpack.c.bf16 %v120_v56, %v120_v56 }
  0x97   :  { %v146_v52 = vunpack.c.l.b16 %v130_v49  ;;  %v150_v3 = vunpack.c.l.b16 %v134_v0 }
  0x9c   :  { %v112_v50 = vpop.f32.mrf.mxu0  ;;  %v122_v63 = vpop.f32.mrf.mxu1 }
  0x9d   :  { %v131_v51 = vpack.c.bf16 %v112_v50, %v112_v50  ;;  %v135_v1 = vpack.c.bf16 %v122_v63, %v122_v63 }
  0x9f   :  { %v147_v53 = vunpack.c.l.b16 %v131_v51  ;;  %v151_v4 = vunpack.c.l.b16 %v135_v1 }
  0xa1   :  { %v154_v54 = vpack.c.b16 %v147_v53, %v146_v52  ;;  %v156_v5 = vpack.c.b16 %v151_v4, %v150_v3 }
  0xa3   :  { %302 = vmatmul.bf16.vlgmr.msrb.gmra.mxu1 %v154_v54 }
  0xa4   :  { %v115_v55 = vpop.f32.mrf.mxu0  ;;  %v125_v2 = vpop.f32.mrf.mxu1 }
  0xa5   :  { %v132_v57 = vpack.c.bf16 %v115_v55, %v115_v55  ;;  %v136_v7 = vpack.c.bf16 %v125_v2, %v125_v2 }
  0xa7   :  { %v148_v60 = vunpack.c.l.b16 %v132_v57  ;;  %v152_v9 = vunpack.c.l.b16 %v136_v7  ;;  %v332_v12 = vpop.f32.mrf.mxu2 }
  0xac   :  { %v117_v58 = vpop.f32.mrf.mxu0  ;;  %v127_v6 = vpop.f32.mrf.mxu1 }
  0xad   :  { %v133_v59 = vpack.c.bf16 %v117_v58, %v117_v58  ;;  %v137_v8 = vpack.c.bf16 %v127_v6, %v127_v6 }
  0xaf   :  { %v149_v61 = vunpack.c.l.b16 %v133_v59  ;;  %v153_v10 = vunpack.c.l.b16 %v137_v8  ;;  %v334_v14 = vpop.f32.mrf.mxu2 }
  0xb1   :  { %v155_v62 = vpack.c.b16 %v149_v61, %v148_v60  ;;  %v157_v11 = vpack.c.b16 %v153_v10, %v152_v9 }
  0xb3   :  { %307 = vmatmul.bf16.gmra.mxu1 %v155_v62 }
  0xb7   :  { %v337_v19 = vpop.f32.mrf.mxu2 }
  0xbf   :  { %v339_v21 = vpop.f32.mrf.mxu2 }
  0xc3   :  { %312 = vmatmul.bf16.gmra.mxu1 %v156_v5 }
  0xc7   :  { %v342_v23 = vpop.f32.mrf.mxu2 }
  0xcf   :  { %v344_v25 = vpop.f32.mrf.mxu2 }
  0xd3   :  { %317 = vmatmul.bf16.gmra.mxu1 %v157_v11 }
  0xd7   :  { %v347_v27 = vpop.f32.mrf.mxu2 }
  0xdf   :  { %v349_v44 = vpop.f32.mrf.mxu2 }
 0x120   :  { %v303_v15 = vpop.f32.mrf.mxu1 }
 0x121   :  { %v304_v16 = vadd.f32 %v2570_v13, %v303_v15  ;;  %v2495_v15 = vld [vmem:[%s3186_s2 + $0xe8] sm:$0xff] }
 0x123   :  { %v333_v17 = vadd.f32 %v332_v12, %v304_v16  ;;  %v2497_v12 = vld [vmem:[%s3186_s2 + $0xf8] sm:$0xff]  ;;  %v2494_v16 = vld [vmem:[%s3186_s2 + $0xe0] sm:$0xff] }
 0x125   :  { %v2742_v1 = vmax.f32 %v333_v17, 0.0  ;;  %v2493_v17 = vld [vmem:[%s3186_s2 + $0xd8] sm:$0xff] }
 0x127   :  { %v360_v7 = vpack.c.bf16 %v2742_v1, %v2742_v1 }
 0x128   :  { %v305_v18 = vpop.f32.mrf.mxu1 }
 0x129   :  { %v306_v45 = vadd.f32 %v2570_v13, %v305_v18  ;;  %v376_v11 = vunpack.c.l.b16 %v360_v7  ;;  %v2492_v18 = vld [vmem:[%s3186_s2 + $0xd0] sm:$0xff]  ;;  %v2511_v7 = vld [vmem:[%s3186_s2 + $0x168] sm:$0xff] }
 0x12b   :  { %v335_v53 = vadd.f32 %v334_v14, %v306_v45  ;;  %v2496_v14 = vld [vmem:[%s3186_s2 + $0xf0] sm:$0xff] }
 0x12d   :  { %v2738_v61 = vmax.f32 %v335_v53, 0.0 }
 0x12f   :  { %v361_v4 = vpack.c.bf16 %v2738_v61, %v2738_v61 }
 0x130   :  { %v308_v20 = vpop.f32.mrf.mxu1 }
 0x131   :  { %v309_v38 = vadd.f32 %v2570_v13, %v308_v20  ;;  %v377_v10 = vunpack.c.l.b16 %v361_v4  ;;  %v2490_v20 = vld [vmem:[%s3186_s2 + $0xc0] sm:$0xff] }
 0x133   :  { %v338_v49 = vadd.f32 %v337_v19, %v309_v38  ;;  %v2491_v19 = vld [vmem:[%s3186_s2 + $0xc8] sm:$0xff] }
 0x135   :  { %v2734_v57 = vmax.f32 %v338_v49, 0.0 }
 0x137   :  { %v362_v2 = vpack.c.bf16 %v2734_v57, %v2734_v57 }
 0x138   :  { %v310_v22 = vpop.f32.mrf.mxu1 }
 0x139   :  { %v311_v35 = vadd.f32 %v2570_v13, %v310_v22  ;;  %v378_v8 = vunpack.c.l.b16 %v362_v2  ;;  %v2488_v22 = vld [vmem:[%s3186_s2 + $0xb0] sm:$0xff]  ;;  %v2513_v2 = vld [vmem:[%s3186_s2 + $0x178] sm:$0xff] }
 0x13b   :  { %v340_v46 = vadd.f32 %v339_v21, %v311_v35  ;;  %v2489_v21 = vld [vmem:[%s3186_s2 + $0xb8] sm:$0xff] }
 0x13c   :  { %587 = vmatpush.bf16.msrb.mxu0 %v2489_v21 }
 0x13d   :  { %v2728_v54 = vmax.f32 %v340_v46, 0.0 }
 0x13f   :  { %v363_v62 = vpack.c.bf16 %v2728_v54, %v2728_v54 }
 0x140   :  { %v313_v24 = vpop.f32.mrf.mxu1  ;;  %588 = vmatpush.bf16.msrb.mxu0 %v2488_v22 }
 0x141   :  { %v314_v31 = vadd.f32 %v2570_v13, %v313_v24  ;;  %v379_v6 = vunpack.c.l.b16 %v363_v62  ;;  %v2486_v24 = vld [vmem:[%s3186_s2 + $0xa0] sm:$0xff] }
 0x143   :  { %v343_v39 = vadd.f32 %v342_v23, %v314_v31  ;;  %v385_v9 = vpack.c.b16 %v379_v6, %v378_v8  ;;  %v2487_v23 = vld [vmem:[%s3186_s2 + $0xa8] sm:$0xff]  ;;  %v2510_v8 = vld [vmem:[%s3186_s2 + $0x160] sm:$0xff] }
 0x144   :  { %589 = vmatpush.bf16.msrb.mxu0 %v2487_v23 }
 0x145   :  { %v2722_v50 = vmax.f32 %v343_v39, 0.0 }
 0x147   :  { %v364_v58 = vpack.c.bf16 %v2722_v50, %v2722_v50 }
 0x148   :  { %v315_v26 = vpop.f32.mrf.mxu1  ;;  %590 = vmatpush.bf16.msrb.mxu0 %v2486_v24 }
 0x149   :  { %v316_v30 = vadd.f32 %v2570_v13, %v315_v26  ;;  %v380_v3 = vunpack.c.l.b16 %v364_v58  ;;  %v2484_v26 = vld [vmem:[%s3186_s2 + $0x90] sm:$0xff] }
 0x14b   :  { %v345_v36 = vadd.f32 %v344_v25, %v316_v30  ;;  %v2485_v25 = vld [vmem:[%s3186_s2 + $0x98] sm:$0xff] }
 0x14c   :  { %591 = vmatpush.bf16.msrb.mxu0 %v2485_v25 }
 0x14d   :  { %v2720_v47 = vmax.f32 %v345_v36, 0.0 }
 0x14f   :  { %v365_v55 = vpack.c.bf16 %v2720_v47, %v2720_v47 }
 0x150   :  { %v318_v28 = vpop.f32.mrf.mxu1  ;;  %592 = vmatpush.bf16.msrb.mxu0 %v2484_v26 }
 0x151   :  { %v319_v29 = vadd.f32 %v2570_v13, %v318_v28  ;;  %v381_v0 = vunpack.c.l.b16 %v365_v55  ;;  %v2482_v28 = vld [vmem:[%s3186_s2 + $0x80] sm:$0xff] }
 0x153   :  { %v348_v32 = vadd.f32 %v347_v27, %v319_v29  ;;  %v386_v5 = vpack.c.b16 %v381_v0, %v380_v3  ;;  %v2483_v27 = vld [vmem:[%s3186_s2 + $0x88] sm:$0xff] }
 0x154   :  { %593 = vmatpush.bf16.msrb.mxu0 %v2483_v27 }
 0x155   :  { %v2718_v40 = vmax.f32 %v348_v32, 0.0 }
 0x157   :  { %v366_v51 = vpack.c.bf16 %v2718_v40, %v2718_v40 }
 0x158   :  { %v320_v37 = vpop.f32.mrf.mxu1  ;;  %594 = vmatpush.bf16.msrb.mxu0 %v2482_v28 }
 0x159   :  { %v321_v43 = vadd.f32 %v2570_v13, %v320_v37  ;;  %v382_v59 = vunpack.c.l.b16 %v366_v51  ;;  %v384_v13 = vpack.c.b16 %v377_v10, %v376_v11  ;;  %v2508_v10 = vld [vmem:[%s3186_s2 + $0x150] sm:$0xff]  ;;  %v2507_v11 = vld [vmem:[%s3186_s2 + $0x148] sm:$0xff] }
 0x15b   :  { %v350_v48 = vadd.f32 %v349_v44, %v321_v43 }
 0x15c   :  { %909 = vmatpush.bf16.msra.mxu0 %v2513_v2 }
 0x15d   :  { %v2726_v52 = vmax.f32 %v350_v48, 0.0 }
 0x15f   :  { %v367_v56 = vpack.c.bf16 %v2726_v52, %v2726_v52 }
 0x161   :  { %v383_v60 = vunpack.c.l.b16 %v367_v56 }
 0x163   :  { %v387_v63 = vpack.c.b16 %v383_v60, %v382_v59 }
 0x165   :  { %396 = vmatpush.bf16.msrb.mxu2 %v387_v63  ;;  %2566 = vmatpush.bf16.msra.mxu3 %v387_v63 }
 0x169   :  { %397 = vmatpush.bf16.msrb.mxu2 %v386_v5  ;;  %2567 = vmatpush.bf16.msra.mxu3 %v386_v5 }
 0x16d   :  { %398 = vmatpush.bf16.msrb.mxu2 %v385_v9  ;;  %2568 = vmatpush.bf16.msra.mxu3 %v385_v9 }
 0x171   :  { %399 = vmatpush.bf16.msrb.mxu2 %v384_v13  ;;  %2569 = vmatpush.bf16.msra.mxu3 %v384_v13 }
 0x174   :  { %1957 = vmatmul.msk.bf16.vlgmr.msrb.gmra.mxu2 %vm88_vm0, %v2656_v33  ;;  %1959 = vmatmul.msk.bf16.vlgmr.msra.gmra.mxu3 %vm88_vm0, %v2661_v34 }
 0x175   :  { %616 = vmatpush.bf16.msrb.mxu3 %v2497_v12  ;;  %v2506_v12 = vld [vmem:[%s3186_s2 + $0x140] sm:$0xff] }
 0x179   :  { %617 = vmatpush.bf16.msrb.mxu3 %v2496_v14  ;;  %v2571_v14 = vld [vmem:[%s3188_s3 + $0x1] ss:$0 sm:$0xff] }
 0x17d   :  { %618 = vmatpush.bf16.msrb.mxu3 %v2495_v15 }
 0x181   :  { %619 = vmatpush.bf16.msrb.mxu3 %v2494_v16 }
 0x184   :  { %1958 = vmatmul.msk.bf16.gmra.mxu2 %vm88_vm0, %v2688_v41  ;;  %1960 = vmatmul.msk.bf16.gmra.mxu3 %vm88_vm0, %v2693_v42 }
 0x185   :  { %620 = vmatpush.bf16.msrb.mxu3 %v2493_v17 }
 0x189   :  { %621 = vmatpush.bf16.msrb.mxu3 %v2492_v18 }
 0x18d   :  { %622 = vmatpush.bf16.msrb.mxu3 %v2491_v19 }
 0x191   :  { %623 = vmatpush.bf16.msrb.mxu3 %v2490_v20 }
 0x194   :  { %624 = vmatmul.bf16.vlgmr.msrb.gmra.mxu3 %v384_v13 }
 0x1a4   :  { %629 = vmatmul.bf16.gmra.mxu3 %v385_v9  ;;  %v2509_v9 = vld [vmem:[%s3186_s2 + $0x158] sm:$0xff] }
 0x1b4   :  { %634 = vmatmul.bf16.gmra.mxu3 %v386_v5  ;;  %v2512_v5 = vld [vmem:[%s3186_s2 + $0x170] sm:$0xff] }
 0x1b5   :  { %910 = vmatpush.bf16.msra.mxu0 %v2512_v5 }
 0x1b9   :  { %911 = vmatpush.bf16.msra.mxu0 %v2511_v7 }
 0x1bd   :  { %912 = vmatpush.bf16.msra.mxu0 %v2510_v8 }
 0x1c1   :  { %913 = vmatpush.bf16.msra.mxu0 %v2509_v9 }
 0x1c4   :  { %639 = vmatmul.bf16.gmra.mxu3 %v387_v63 }
 0x1c5   :  { %914 = vmatpush.bf16.msra.mxu0 %v2508_v10 }
 0x1c9   :  { %915 = vmatpush.bf16.msra.mxu0 %v2507_v11 }
 0x1cd   :  { %916 = vmatpush.bf16.msra.mxu0 %v2506_v12 }
 0x1f7   :  { %v401_v29 = vpop.f32.mrf.mxu2  ;;  %v411_v39 = vpop.f32.mrf.mxu3 }
 0x1f8   :  { %v421_v30 = vpack.c.bf16 %v401_v29, %v401_v29  ;;  %v425_v53 = vpack.c.bf16 %v411_v39, %v411_v39 }
 0x1fa   :  { %v437_v35 = vunpack.c.l.b16 %v421_v30  ;;  %v441_v56 = vunpack.c.l.b16 %v425_v53 }
 0x1ff   :  { %v403_v31 = vpop.f32.mrf.mxu2  ;;  %v413_v51 = vpop.f32.mrf.mxu3 }
 0x200   :  { %v422_v32 = vpack.c.bf16 %v403_v31, %v403_v31  ;;  %v426_v55 = vpack.c.bf16 %v413_v51, %v413_v51 }
 0x202   :  { %v438_v36 = vunpack.c.l.b16 %v422_v32  ;;  %v442_v58 = vunpack.c.l.b16 %v426_v55 }
 0x204   :  { %v445_v37 = vpack.c.b16 %v438_v36, %v437_v35  ;;  %v447_v60 = vpack.c.b16 %v442_v58, %v441_v56 }
 0x206   :  { %595 = vmatmul.bf16.vlgmr.msrb.gmra.mxu0 %v445_v37 }
 0x207   :  { %v406_v38 = vpop.f32.mrf.mxu2  ;;  %v416_v59 = vpop.f32.mrf.mxu3 }
 0x208   :  { %v423_v43 = vpack.c.bf16 %v406_v38, %v406_v38  ;;  %v427_v63 = vpack.c.bf16 %v416_v59, %v416_v59 }
 0x20a   :  { %v439_v46 = vunpack.c.l.b16 %v423_v43  ;;  %v443_v3 = vunpack.c.l.b16 %v427_v63 }
 0x20f   :  { %v408_v44 = vpop.f32.mrf.mxu2  ;;  %v418_v62 = vpop.f32.mrf.mxu3 }
 0x210   :  { %v424_v45 = vpack.c.bf16 %v408_v44, %v408_v44  ;;  %v428_v0 = vpack.c.bf16 %v418_v62, %v418_v62 }
 0x212   :  { %v440_v48 = vunpack.c.l.b16 %v424_v45  ;;  %v444_v4 = vunpack.c.l.b16 %v428_v0 }
 0x214   :  { %v446_v49 = vpack.c.b16 %v440_v48, %v439_v46  ;;  %v448_v6 = vpack.c.b16 %v444_v4, %v443_v3 }
 0x216   :  { %600 = vmatmul.bf16.gmra.mxu0 %v446_v49 }
 0x217   :  { %v625_v13 = vpop.f32.mrf.mxu3 }
 0x21f   :  { %v627_v15 = vpop.f32.mrf.mxu3 }
 0x226   :  { %605 = vmatmul.bf16.gmra.mxu0 %v447_v60 }
 0x227   :  { %v630_v19 = vpop.f32.mrf.mxu3 }
 0x22f   :  { %v632_v31 = vpop.f32.mrf.mxu3 }
 0x236   :  { %610 = vmatmul.bf16.gmra.mxu0 %v448_v6 }
 0x237   :  { %v635_v43 = vpop.f32.mrf.mxu3 }
 0x23f   :  { %v637_v58 = vpop.f32.mrf.mxu3 }
 0x247   :  { %v640_v4 = vpop.f32.mrf.mxu3 }
 0x283   :  { %v596_v16 = vpop.f32.mrf.mxu0 }
 0x284   :  { %v597_v17 = vadd.f32 %v2571_v14, %v596_v16 }
 0x286   :  { %v626_v18 = vadd.f32 %v625_v13, %v597_v17 }
 0x288   :  { %v645_v21 = vmax.f32 %v626_v18, 0.0 }
 0x28a   :  { %v653_v24 = vpack.c.bf16 %v645_v21, %v645_v21 }
 0x28b   :  { %v598_v20 = vpop.f32.mrf.mxu0 }
 0x28c   :  { %v599_v22 = vadd.f32 %v2571_v14, %v598_v20  ;;  %v669_v28 = vunpack.c.l.b16 %v653_v24  ;;  %v2503_v24 = vld [vmem:[%s3186_s2 + $0x128] sm:$0xff] }
 0x28e   :  { %v628_v23 = vadd.f32 %v627_v15, %v599_v22  ;;  %v642_v15 = vpop.f32.mrf.mxu3 }
 0x290   :  { %v646_v25 = vmax.f32 %v628_v23, 0.0  ;;  %v2504_v23 = vld [vmem:[%s3186_s2 + $0x130] sm:$0xff] }
 0x292   :  { %v654_v26 = vpack.c.bf16 %v646_v25, %v646_v25  ;;  %v2502_v25 = vld [vmem:[%s3186_s2 + $0x120] sm:$0xff] }
 0x293   :  { %v601_v27 = vpop.f32.mrf.mxu0 }
 0x294   :  { %v670_v29 = vunpack.c.l.b16 %v654_v26  ;;  %v602_v30 = vadd.f32 %v2571_v14, %v601_v27  ;;  %v2501_v26 = vld [vmem:[%s3186_s2 + $0x118] sm:$0xff]  ;;  %v2500_v27 = vld [vmem:[%s3186_s2 + $0x110] sm:$0xff] }
 0x296   :  { %v677_v32 = vpack.c.b16 %v670_v29, %v669_v28  ;;  %v631_v35 = vadd.f32 %v630_v19, %v602_v30  ;;  %v2499_v28 = vld [vmem:[%s3186_s2 + $0x108] sm:$0xff]  ;;  %v2498_v29 = vld [vmem:[%s3186_s2 + $0x100] sm:$0xff] }
 0x298   :  { %917 = vmatmul.bf16.vlgmr.msra.gmra.mxu0 %v677_v32  ;;  %v647_v37 = vmax.f32 %v631_v35, 0.0 }
 0x29a   :  { %v655_v44 = vpack.c.bf16 %v647_v37, %v647_v37 }
 0x29b   :  { %v603_v36 = vpop.f32.mrf.mxu0 }
 0x29c   :  { %v604_v38 = vadd.f32 %v2571_v14, %v603_v36  ;;  %v671_v51 = vunpack.c.l.b16 %v655_v44 }
 0x29e   :  { %v633_v39 = vadd.f32 %v632_v31, %v604_v38 }
 0x2a0   :  { %v648_v45 = vmax.f32 %v633_v39, 0.0 }
 0x2a2   :  { %v656_v46 = vpack.c.bf16 %v648_v45, %v648_v45 }
 0x2a3   :  { %v606_v48 = vpop.f32.mrf.mxu0 }
 0x2a4   :  { %v607_v49 = vadd.f32 %v2571_v14, %v606_v48  ;;  %v672_v53 = vunpack.c.l.b16 %v656_v46 }
 0x2a6   :  { %v678_v55 = vpack.c.b16 %v672_v53, %v671_v51  ;;  %v636_v56 = vadd.f32 %v635_v43, %v607_v49  ;;  %v2529_v51 = vld [vmem:[%s3186_s2 + $0x1f8] sm:$0xff] }
 0x2a8   :  { %922 = vmatmul.bf16.gmra.mxu0 %v678_v55  ;;  %v649_v60 = vmax.f32 %v636_v56, 0.0 }
 0x2aa   :  { %v657_v0 = vpack.c.bf16 %v649_v60, %v649_v60 }
 0x2ab   :  { %v608_v59 = vpop.f32.mrf.mxu0 }
 0x2ac   :  { %v609_v62 = vadd.f32 %v2571_v14, %v608_v59  ;;  %v673_v7 = vunpack.c.l.b16 %v657_v0 }
 0x2ae   :  { %v638_v63 = vadd.f32 %v637_v58, %v609_v62 }
 0x2b0   :  { %v650_v2 = vmax.f32 %v638_v63, 0.0 }
 0x2b2   :  { %v658_v3 = vpack.c.bf16 %v650_v2, %v650_v2 }
 0x2b3   :  { %v611_v5 = vpop.f32.mrf.mxu0 }
 0x2b4   :  { %v612_v6 = vadd.f32 %v2571_v14, %v611_v5  ;;  %v674_v8 = vunpack.c.l.b16 %v658_v3 }
 0x2b6   :  { %v679_v9 = vpack.c.b16 %v674_v8, %v673_v7  ;;  %v641_v10 = vadd.f32 %v640_v4, %v612_v6  ;;  %v2527_v8 = vld [vmem:[%s3186_s2 + $0x1e8] sm:$0xff] }
 0x2b8   :  { %927 = vmatmul.bf16.gmra.mxu0 %v679_v9  ;;  %v651_v12 = vmax.f32 %v641_v10, 0.0  ;;  %v2525_v10 = vld [vmem:[%s3186_s2 + $0x1d8] sm:$0xff] }
 0x2ba   :  { %v659_v17 = vpack.c.bf16 %v651_v12, %v651_v12  ;;  %v2523_v12 = vld [vmem:[%s3186_s2 + $0x1c8] sm:$0xff] }
 0x2bb   :  { %v613_v11 = vpop.f32.mrf.mxu0 }
 0x2bc   :  { %v614_v13 = vadd.f32 %v2571_v14, %v613_v11  ;;  %v675_v20 = vunpack.c.l.b16 %v659_v17  ;;  %v2505_v14 = vld [vmem:[%s3186_s2 + $0x138] sm:$0xff]  ;;  %v2524_v11 = vld [vmem:[%s3186_s2 + $0x1d0] sm:$0xff] }
 0x2bd   :  { %880 = vmatpush.bf16.msra.mxu2 %v2505_v14 }
 0x2be   :  { %v643_v16 = vadd.f32 %v642_v15, %v614_v13  ;;  %v2522_v15 = vld [vmem:[%s3186_s2 + $0x1c0] sm:$0xff] }
 0x2c0   :  { %v652_v18 = vmax.f32 %v643_v16, 0.0  ;;  %v2892_v16 = vld [vmem:[%s3188_s3 + $0x2] ss:$0 sm:$0xff] }
 0x2c1   :  { %881 = vmatpush.bf16.msra.mxu2 %v2504_v23 }
 0x2c2   :  { %v660_v19 = vpack.c.bf16 %v652_v18, %v652_v18 }
 0x2c4   :  { %v676_v21 = vunpack.c.l.b16 %v660_v19 }
 0x2c5   :  { %882 = vmatpush.bf16.msra.mxu2 %v2503_v24 }
 0x2c6   :  { %v680_v22 = vpack.c.b16 %v676_v21, %v675_v20 }
 0x2c8   :  { %689 = vmatpush.bf16.msra.mxu1 %v680_v22  ;;  %932 = vmatmul.bf16.gmra.mxu0 %v680_v22 }
 0x2c9   :  { %883 = vmatpush.bf16.msra.mxu2 %v2502_v25 }
 0x2cc   :  { %690 = vmatpush.bf16.msra.mxu1 %v679_v9  ;;  %v2526_v9 = vld [vmem:[%s3186_s2 + $0x1e0] sm:$0xff] }
 0x2cd   :  { %884 = vmatpush.bf16.msra.mxu2 %v2501_v26 }
 0x2d0   :  { %691 = vmatpush.bf16.msra.mxu1 %v678_v55  ;;  %v2528_v55 = vld [vmem:[%s3186_s2 + $0x1f0] sm:$0xff] }
 0x2d1   :  { %885 = vmatpush.bf16.msra.mxu2 %v2500_v27 }
 0x2d4   :  { %692 = vmatpush.bf16.msra.mxu1 %v677_v32 }
 0x2d5   :  { %886 = vmatpush.bf16.msra.mxu2 %v2499_v28 }
 0x2d7   :  { %2058 = vmatmul.msk.bf16.vlgmr.msra.gmra.mxu1 %vm88_vm0, %v2656_v33 }
 0x2d9   :  { %887 = vmatpush.bf16.msra.mxu2 %v2498_v29 }
 0x2dd   :  { %1218 = vmatpush.bf16.msrb.mxu2 %v2529_v51 }
 0x2e1   :  { %1219 = vmatpush.bf16.msrb.mxu2 %v2528_v55 }
 0x2e5   :  { %1220 = vmatpush.bf16.msrb.mxu2 %v2527_v8 }
 0x2e7   :  { %2059 = vmatmul.msk.bf16.gmra.mxu1 %vm88_vm0, %v2688_v41 }
 0x2e9   :  { %1221 = vmatpush.bf16.msrb.mxu2 %v2526_v9 }
 0x2ed   :  { %1222 = vmatpush.bf16.msrb.mxu2 %v2525_v10 }
 0x2f1   :  { %1223 = vmatpush.bf16.msrb.mxu2 %v2524_v11 }
 0x2f5   :  { %1224 = vmatpush.bf16.msrb.mxu2 %v2523_v12 }
 0x2f7   :  { %2060 = vmatmul.msk.bf16.gmra.mxu1 %vm88_vm0, %v2661_v34 }
 0x2f9   :  { %1225 = vmatpush.bf16.msrb.mxu2 %v2522_v15 }
 0x307   :  { %2061 = vmatmul.msk.bf16.gmra.mxu1 %vm88_vm0, %v2693_v42 }
 0x315   :  { %v918_v13 = vpop.f32.mrf.mxu0 }
 0x31d   :  { %v920_v17 = vpop.f32.mrf.mxu0 }
 0x325   :  { %v923_v22 = vpop.f32.mrf.mxu0 }
 0x354   :  { %v694_v30 = vpop.f32.mrf.mxu1 }
 0x355   :  { %v714_v31 = vpack.c.bf16 %v694_v30, %v694_v30 }
 0x357   :  { %v730_v36 = vunpack.c.l.b16 %v714_v31 }
 0x35c   :  { %v696_v32 = vpop.f32.mrf.mxu1 }
 0x35d   :  { %v715_v35 = vpack.c.bf16 %v696_v32, %v696_v32 }
 0x35f   :  { %v731_v37 = vunpack.c.l.b16 %v715_v35  ;;  %v925_v35 = vpop.f32.mrf.mxu0 }
 0x361   :  { %v738_v38 = vpack.c.b16 %v731_v37, %v730_v36 }
 0x363   :  { %888 = vmatmul.bf16.vlgmr.msra.gmra.mxu2 %v738_v38 }
 0x364   :  { %v699_v39 = vpop.f32.mrf.mxu1 }
 0x365   :  { %v716_v43 = vpack.c.bf16 %v699_v39, %v699_v39 }
 0x367   :  { %v732_v46 = vunpack.c.l.b16 %v716_v43 }
 0x36c   :  { %v701_v44 = vpop.f32.mrf.mxu1 }
 0x36d   :  { %v717_v45 = vpack.c.bf16 %v701_v44, %v701_v44 }
 0x36f   :  { %v733_v48 = vunpack.c.l.b16 %v717_v45 }
 0x371   :  { %v739_v49 = vpack.c.b16 %v733_v48, %v732_v46  ;;  %v928_v48 = vpop.f32.mrf.mxu0 }
 0x373   :  { %893 = vmatmul.bf16.gmra.mxu2 %v739_v49 }
 0x374   :  { %v704_v53 = vpop.f32.mrf.mxu1 }
 0x375   :  { %v718_v56 = vpack.c.bf16 %v704_v53, %v704_v53 }
 0x377   :  { %v734_v60 = vunpack.c.l.b16 %v718_v56 }
 0x37c   :  { %v706_v58 = vpop.f32.mrf.mxu1 }
 0x37d   :  { %v719_v59 = vpack.c.bf16 %v706_v58, %v706_v58 }
 0x37f   :  { %v735_v62 = vunpack.c.l.b16 %v719_v59 }
 0x381   :  { %v740_v63 = vpack.c.b16 %v735_v62, %v734_v60 }
 0x383   :  { %898 = vmatmul.bf16.gmra.mxu2 %v740_v63 }
 0x384   :  { %v709_v0 = vpop.f32.mrf.mxu1 }
 0x385   :  { %v720_v2 = vpack.c.bf16 %v709_v0, %v709_v0 }
 0x387   :  { %v736_v5 = vunpack.c.l.b16 %v720_v2  ;;  %v930_v2 = vpop.f32.mrf.mxu0 }
 0x38c   :  { %v711_v3 = vpop.f32.mrf.mxu1 }
 0x38d   :  { %v721_v4 = vpack.c.bf16 %v711_v3, %v711_v3 }
 0x38f   :  { %v737_v6 = vunpack.c.l.b16 %v721_v4  ;;  %v933_v10 = vpop.f32.mrf.mxu0 }
 0x391   :  { %v741_v7 = vpack.c.b16 %v737_v6, %v736_v5 }
 0x393   :  { %903 = vmatmul.bf16.gmra.mxu2 %v741_v7 }
 0x3e6   :  { %v889_v18 = vpop.f32.mrf.mxu2 }
 0x3e7   :  { %v890_v19 = vadd.f32 %v2892_v16, %v889_v18 }
 0x3e9   :  { %v919_v20 = vadd.f32 %v918_v13, %v890_v19 }
 0x3eb   :  { %v938_v21 = vmax.f32 %v919_v20, 0.0 }
 0x3ed   :  { %v946_v23 = vadd.f32 %v938_v21, %v2742_v1 }
 0x3ee   :  { %v891_v14 = vpop.f32.mrf.mxu2 }
 0x3ef   :  { %v892_v24 = vadd.f32 %v2892_v16, %v891_v14  ;;  %v2897_v26 = vmul.f32 0.5, %v946_v23  ;;  %v935_v23 = vpop.f32.mrf.mxu0 }
 0x3f1   :  { %v921_v25 = vadd.f32 %v920_v17, %v892_v24  ;;  %v962_v30 = vpack.c.bf16 %v2897_v26, %v2897_v26 }
 0x3f3   :  { %v939_v27 = vmax.f32 %v921_v25, 0.0  ;;  %v978_v37 = vunpack.c.l.b16 %v962_v30 }
 0x3f5   :  { %v947_v28 = vadd.f32 %v939_v27, %v2738_v61 }
 0x3f6   :  { %v894_v29 = vpop.f32.mrf.mxu2 }
 0x3f7   :  { %v2902_v31 = vmul.f32 0.5, %v947_v28  ;;  %v895_v32 = vadd.f32 %v2892_v16, %v894_v29 }
 0x3f9   :  { %v963_v1 = vpack.c.bf16 %v2902_v31, %v2902_v31  ;;  %v924_v36 = vadd.f32 %v923_v22, %v895_v32 }
 0x3fb   :  { %v979_v38 = vunpack.c.l.b16 %v963_v1  ;;  %v940_v39 = vmax.f32 %v924_v36, 0.0  ;;  %v2515_v36 = vld [vmem:[%s3186_s2 + $0x188] sm:$0xff] }
 0x3fd   :  { %v986_v43 = vpack.c.b16 %v979_v38, %v978_v37  ;;  %v948_v61 = vadd.f32 %v940_v39, %v2734_v57  ;;  %v2514_v37 = vld [vmem:[%s3186_s2 + $0x180] sm:$0xff] }
 0x3fe   :  { %v896_v44 = vpop.f32.mrf.mxu2 }
 0x3ff   :  { %v897_v45 = vadd.f32 %v2892_v16, %v896_v44  ;;  %1226 = vmatmul.bf16.vlgmr.msrb.gmra.mxu2 %v986_v43  ;;  %v2909_v49 = vmul.f32 0.5, %v948_v61 }
 0x401   :  { %v926_v46 = vadd.f32 %v925_v35, %v897_v45  ;;  %v964_v59 = vpack.c.bf16 %v2909_v49, %v2909_v49 }
 0x403   :  { %v941_v51 = vmax.f32 %v926_v46, 0.0  ;;  %v980_v63 = vunpack.c.l.b16 %v964_v59 }
 0x405   :  { %v949_v53 = vadd.f32 %v941_v51, %v2728_v54 }
 0x406   :  { %v899_v55 = vpop.f32.mrf.mxu2 }
 0x407   :  { %v2912_v56 = vmul.f32 0.5, %v949_v53  ;;  %v900_v58 = vadd.f32 %v2892_v16, %v899_v55 }
 0x409   :  { %v929_v60 = vadd.f32 %v928_v48, %v900_v58  ;;  %v965_v57 = vpack.c.bf16 %v2912_v56, %v2912_v56 }
 0x40b   :  { %v942_v62 = vmax.f32 %v929_v60, 0.0  ;;  %v981_v0 = vunpack.c.l.b16 %v965_v57  ;;  %v2545_v57 = vld [vmem:[%s3186_s2 + $0x278] sm:$0xff] }
 0x40d   :  { %v987_v3 = vpack.c.b16 %v981_v0, %v980_v63  ;;  %v950_v54 = vadd.f32 %v942_v62, %v2722_v50  ;;  %v2544_v63 = vld [vmem:[%s3186_s2 + $0x270] sm:$0xff]  ;;  %v2543_v0 = vld [vmem:[%s3186_s2 + $0x268] sm:$0xff] }
 0x40e   :  { %v901_v4 = vpop.f32.mrf.mxu2 }
 0x40f   :  { %v902_v5 = vadd.f32 %v2892_v16, %v901_v4  ;;  %1231 = vmatmul.bf16.gmra.mxu2 %v987_v3  ;;  %v2921_v7 = vmul.f32 0.5, %v950_v54 }
 0x411   :  { %v931_v6 = vadd.f32 %v930_v2, %v902_v5  ;;  %v966_v15 = vpack.c.bf16 %v2921_v7, %v2921_v7 }
 0x413   :  { %v943_v8 = vmax.f32 %v931_v6, 0.0  ;;  %v982_v19 = vunpack.c.l.b16 %v966_v15 }
 0x415   :  { %v951_v9 = vadd.f32 %v943_v8, %v2720_v47 }
 0x416   :  { %v904_v11 = vpop.f32.mrf.mxu2 }
 0x417   :  { %v2924_v12 = vmul.f32 0.5, %v951_v9  ;;  %v905_v13 = vadd.f32 %v2892_v16, %v904_v11 }
 0x419   :  { %v934_v17 = vadd.f32 %v933_v10, %v905_v13  ;;  %v967_v50 = vpack.c.bf16 %v2924_v12, %v2924_v12 }
 0x41b   :  { %v944_v18 = vmax.f32 %v934_v17, 0.0  ;;  %v983_v20 = vunpack.c.l.b16 %v967_v50  ;;  %v2542_v50 = vld [vmem:[%s3186_s2 + $0x260] sm:$0xff] }
 0x41d   :  { %v988_v21 = vpack.c.b16 %v983_v20, %v982_v19  ;;  %v952_v47 = vadd.f32 %v944_v18, %v2718_v40  ;;  %v2541_v18 = vld [vmem:[%s3186_s2 + $0x258] sm:$0xff]  ;;  %v2540_v19 = vld [vmem:[%s3186_s2 + $0x250] sm:$0xff]  ;;  %v2539_v20 = vld [vmem:[%s3186_s2 + $0x248] sm:$0xff] }
 0x41e   :  { %v906_v22 = vpop.f32.mrf.mxu2 }
 0x41f   :  { %v907_v14 = vadd.f32 %v2892_v16, %v906_v22  ;;  %1236 = vmatmul.bf16.gmra.mxu2 %v988_v21  ;;  %v2933_v25 = vmul.f32 0.5, %v952_v47  ;;  %v2520_v16 = vld [vmem:[%s3186_s2 + $0x1b0] sm:$0xff]  ;;  %v2573_v47 = vld [vmem:[%s3188_s3 + $0x3] ss:$0 sm:$0xff] }
 0x421   :  { %v936_v24 = vadd.f32 %v935_v23, %v907_v14  ;;  %v968_v29 = vpack.c.bf16 %v2933_v25, %v2933_v25 }
 0x423   :  { %v945_v27 = vmax.f32 %v936_v24, 0.0  ;;  %v984_v35 = vunpack.c.l.b16 %v968_v29 }
 0x425   :  { %v953_v28 = vadd.f32 %v945_v27, %v2726_v52  ;;  %v2521_v52 = vld [vmem:[%s3186_s2 + $0x1b8] sm:$0xff] }
 0x426   :  { %1189 = vmatpush.bf16.msrb.mxu1 %v2521_v52 }
 0x427   :  { %v2938_v30 = vmul.f32 0.5, %v953_v28 }
 0x429   :  { %v969_v32 = vpack.c.bf16 %v2938_v30, %v2938_v30 }
 0x42a   :  { %1190 = vmatpush.bf16.msrb.mxu1 %v2520_v16 }
 0x42b   :  { %v985_v40 = vunpack.c.l.b16 %v969_v32 }
 0x42d   :  { %v989_v1 = vpack.c.b16 %v985_v40, %v984_v35 }
 0x42f   :  { %998 = vmatpush.bf16.msra.mxu3 %v989_v1  ;;  %1241 = vmatmul.bf16.gmra.mxu2 %v989_v1 }
 0x433   :  { %999 = vmatpush.bf16.msra.mxu3 %v988_v21  ;;  %v2538_v21 = vld [vmem:[%s3186_s2 + $0x240] sm:$0xff] }
 0x437   :  { %1000 = vmatpush.bf16.msra.mxu3 %v987_v3 }
 0x43b   :  { %1001 = vmatpush.bf16.msra.mxu3 %v986_v43 }
 0x43e   :  { %2159 = vmatmul.msk.bf16.vlgmr.msra.gmra.mxu3 %vm88_vm0, %v2656_v33  ;;  %v2519_v33 = vld [vmem:[%s3186_s2 + $0x1a8] sm:$0xff] }
 0x43f   :  { %1191 = vmatpush.bf16.msrb.mxu1 %v2519_v33 }
 0x44e   :  { %2160 = vmatmul.msk.bf16.gmra.mxu3 %vm88_vm0, %v2688_v41  ;;  %v2517_v41 = vld [vmem:[%s3186_s2 + $0x198] sm:$0xff] }
 0x45e   :  { %2161 = vmatmul.msk.bf16.gmra.mxu3 %vm88_vm0, %v2661_v34  ;;  %v2518_v34 = vld [vmem:[%s3186_s2 + $0x1a0] sm:$0xff] }
 0x45f   :  { %1192 = vmatpush.bf16.msrb.mxu1 %v2518_v34 }
 0x463   :  { %1193 = vmatpush.bf16.msrb.mxu1 %v2517_v41 }
 0x46e   :  { %2162 = vmatmul.msk.bf16.gmra.mxu3 %vm88_vm0, %v2693_v42  ;;  %v2516_v42 = vld [vmem:[%s3186_s2 + $0x190] sm:$0xff] }
 0x46f   :  { %1194 = vmatpush.bf16.msrb.mxu1 %v2516_v42 }
 0x473   :  { %1195 = vmatpush.bf16.msrb.mxu1 %v2515_v36 }
 0x477   :  { %1196 = vmatpush.bf16.msrb.mxu1 %v2514_v37 }
 0x47b   :  { %1511 = vmatpush.bf16.msra.mxu1 %v2545_v57 }
 0x47f   :  { %1512 = vmatpush.bf16.msra.mxu1 %v2544_v63 }
 0x482   :  { %v1227_v22 = vpop.f32.mrf.mxu2 }
 0x483   :  { %1513 = vmatpush.bf16.msra.mxu1 %v2543_v0 }
 0x487   :  { %1514 = vmatpush.bf16.msra.mxu1 %v2542_v50 }
 0x48a   :  { %v1229_v14 = vpop.f32.mrf.mxu2 }
 0x48b   :  { %1515 = vmatpush.bf16.msra.mxu1 %v2541_v18 }
 0x48f   :  { %1516 = vmatpush.bf16.msra.mxu1 %v2540_v19 }
 0x492   :  { %v1232_v28 = vpop.f32.mrf.mxu2 }
 0x493   :  { %1517 = vmatpush.bf16.msra.mxu1 %v2539_v20 }
 0x497   :  { %1518 = vmatpush.bf16.msra.mxu1 %v2538_v21 }
 0x49a   :  { %v1234_v36 = vpop.f32.mrf.mxu2 }
 0x4c1   :  { %v1003_v38 = vpop.f32.mrf.mxu3 }
 0x4c2   :  { %v1023_v39 = vpack.c.bf16 %v1003_v38, %v1003_v38 }
 0x4c4   :  { %v1039_v61 = vunpack.c.l.b16 %v1023_v39 }
 0x4c9   :  { %v1005_v43 = vpop.f32.mrf.mxu3 }
 0x4ca   :  { %v1024_v44 = vpack.c.bf16 %v1005_v43, %v1005_v43 }
 0x4cc   :  { %v1040_v45 = vunpack.c.l.b16 %v1024_v44 }
 0x4ce   :  { %v1047_v46 = vpack.c.b16 %v1040_v45, %v1039_v61  ;;  %v1237_v45 = vpop.f32.mrf.mxu2 }
 0x4d0   :  { %1197 = vmatmul.bf16.vlgmr.msrb.gmra.mxu1 %v1047_v46 }
 0x4d1   :  { %v1008_v48 = vpop.f32.mrf.mxu3 }
 0x4d2   :  { %v1025_v51 = vpack.c.bf16 %v1008_v48, %v1008_v48 }
 0x4d4   :  { %v1041_v58 = vunpack.c.l.b16 %v1025_v51 }
 0x4d9   :  { %v1010_v53 = vpop.f32.mrf.mxu3 }
 0x4da   :  { %v1026_v55 = vpack.c.bf16 %v1010_v53, %v1010_v53 }
 0x4dc   :  { %v1042_v59 = vunpack.c.l.b16 %v1026_v55 }
 0x4de   :  { %v1048_v60 = vpack.c.b16 %v1042_v59, %v1041_v58 }
 0x4e0   :  { %1202 = vmatmul.bf16.gmra.mxu1 %v1048_v60 }
 0x4e1   :  { %v1013_v62 = vpop.f32.mrf.mxu3 }
 0x4e2   :  { %v1027_v2 = vpack.c.bf16 %v1013_v62, %v1013_v62  ;;  %v1239_v62 = vpop.f32.mrf.mxu2 }
 0x4e4   :  { %v1043_v54 = vunpack.c.l.b16 %v1027_v2 }
 0x4e9   :  { %v1015_v3 = vpop.f32.mrf.mxu3 }
 0x4ea   :  { %v1028_v4 = vpack.c.bf16 %v1015_v3, %v1015_v3 }
 0x4ec   :  { %v1044_v5 = vunpack.c.l.b16 %v1028_v4 }
 0x4ee   :  { %v1049_v6 = vpack.c.b16 %v1044_v5, %v1043_v54 }
 0x4f0   :  { %1207 = vmatmul.bf16.gmra.mxu1 %v1049_v6  ;;  %v1242_v6 = vpop.f32.mrf.mxu2 }
 0x4f1   :  { %v1018_v8 = vpop.f32.mrf.mxu3 }
 0x4f2   :  { %v1029_v9 = vpack.c.bf16 %v1018_v8, %v1018_v8 }
 0x4f4   :  { %v1045_v13 = vunpack.c.l.b16 %v1029_v9 }
 0x4f8   :  { %v1244_v19 = vpop.f32.mrf.mxu2 }
 0x4f9   :  { %v1020_v10 = vpop.f32.mrf.mxu3 }
 0x4fa   :  { %v1030_v11 = vpack.c.bf16 %v1020_v10, %v1020_v10 }
 0x4fc   :  { %v1046_v15 = vunpack.c.l.b16 %v1030_v11 }
 0x4fe   :  { %v1050_v17 = vpack.c.b16 %v1046_v15, %v1045_v13 }
 0x500   :  { %1212 = vmatmul.bf16.gmra.mxu1 %v1050_v17 }
 0x54d   :  { %v1198_v23 = vpop.f32.mrf.mxu1 }
 0x54e   :  { %v1199_v24 = vadd.f32 %v2573_v47, %v1198_v23 }
 0x550   :  { %v1228_v27 = vadd.f32 %v1227_v22, %v1199_v24 }
 0x552   :  { %v1247_v32 = vmax.f32 %v1228_v27, 0.0 }
 0x554   :  { %v1255_v1 = vpack.c.bf16 %v1247_v32, %v1247_v32  ;;  %v3025_v32 = vld [vmem:[%s3187_s1 + $0x18] sm:$0xff] }
 0x555   :  { %v1200_v29 = vpop.f32.mrf.mxu1 }
 0x556   :  { %v1201_v35 = vadd.f32 %v2573_v47, %v1200_v29  ;;  %v1271_v34 = vunpack.c.l.b16 %v1255_v1  ;;  %v3018_v29 = vld [vmem:[%s3187_s1 + $0x10] sm:$0xff]  ;;  %v2535_v1 = vld [vmem:[%s3186_s2 + $0x228] sm:$0xff] }
 0x558   :  { %v1230_v40 = vadd.f32 %v1229_v14, %v1201_v35  ;;  %v2537_v35 = vld [vmem:[%s3186_s2 + $0x238] sm:$0xff] }
 0x559   :  { %1482 = vmatpush.bf16.msrb.mxu3 %v2537_v35 }
 0x55a   :  { %v1248_v52 = vmax.f32 %v1230_v40, 0.0  ;;  %v2536_v40 = vld [vmem:[%s3186_s2 + $0x230] sm:$0xff] }
 0x55c   :  { %v1256_v16 = vpack.c.bf16 %v1248_v52, %v1248_v52  ;;  %v2534_v52 = vld [vmem:[%s3186_s2 + $0x220] sm:$0xff] }
 0x55d   :  { %v1203_v33 = vpop.f32.mrf.mxu1  ;;  %1483 = vmatpush.bf16.msrb.mxu3 %v2536_v40 }
 0x55e   :  { %v1272_v41 = vunpack.c.l.b16 %v1256_v16  ;;  %v1204_v42 = vadd.f32 %v2573_v47, %v1203_v33  ;;  %v2533_v16 = vld [vmem:[%s3186_s2 + $0x218] sm:$0xff]  ;;  %v2532_v33 = vld [vmem:[%s3186_s2 + $0x210] sm:$0xff] }
 0x560   :  { %v1279_v37 = vpack.c.b16 %v1272_v41, %v1271_v34  ;;  %v1233_v38 = vadd.f32 %v1232_v28, %v1204_v42  ;;  %v3004_v28 = vld [vmem:[%s3187_s1] sm:$0xff]  ;;  %v2531_v34 = vld [vmem:[%s3186_s2 + $0x208] sm:$0xff] }
 0x561   :  { %1484 = vmatpush.bf16.msrb.mxu3 %v2535_v1  ;;  %v2530_v41 = vld [vmem:[%s3186_s2 + $0x200] sm:$0xff] }
 0x562   :  { %1519 = vmatmul.bf16.vlgmr.msra.gmra.mxu1 %v1279_v37  ;;  %v1249_v43 = vmax.f32 %v1233_v38, 0.0 }
 0x564   :  { %v1257_v46 = vpack.c.bf16 %v1249_v43, %v1249_v43 }
 0x565   :  { %v1205_v39 = vpop.f32.mrf.mxu1  ;;  %1485 = vmatpush.bf16.msrb.mxu3 %v2534_v52 }
 0x566   :  { %v1206_v44 = vadd.f32 %v2573_v47, %v1205_v39  ;;  %v1273_v55 = vunpack.c.l.b16 %v1257_v46 }
 0x568   :  { %v1235_v61 = vadd.f32 %v1234_v36, %v1206_v44 }
 0x569   :  { %1486 = vmatpush.bf16.msrb.mxu3 %v2533_v16 }
 0x56a   :  { %v1250_v48 = vmax.f32 %v1235_v61, 0.0 }
 0x56c   :  { %v1258_v51 = vpack.c.bf16 %v1250_v48, %v1250_v48 }
 0x56d   :  { %v1208_v53 = vpop.f32.mrf.mxu1  ;;  %1487 = vmatpush.bf16.msrb.mxu3 %v2532_v33 }
 0x56e   :  { %v1274_v58 = vunpack.c.l.b16 %v1258_v51  ;;  %v1209_v59 = vadd.f32 %v2573_v47, %v1208_v53 }
 0x570   :  { %v1280_v60 = vpack.c.b16 %v1274_v58, %v1273_v55  ;;  %v1238_v57 = vadd.f32 %v1237_v45, %v1209_v59  ;;  %v2561_v58 = vld [vmem:[%s3186_s2 + $0x2f8] sm:$0xff] }
 0x571   :  { %1488 = vmatpush.bf16.msrb.mxu3 %v2531_v34 }
 0x572   :  { %1524 = vmatmul.bf16.gmra.mxu1 %v1280_v60  ;;  %v1251_v0 = vmax.f32 %v1238_v57, 0.0 }
 0x574   :  { %v1259_v4 = vpack.c.bf16 %v1251_v0, %v1251_v0 }
 0x575   :  { %v1210_v63 = vpop.f32.mrf.mxu1  ;;  %1489 = vmatpush.bf16.msrb.mxu3 %v2530_v41 }
 0x576   :  { %v1211_v2 = vadd.f32 %v2573_v47, %v1210_v63  ;;  %v1275_v9 = vunpack.c.l.b16 %v1259_v4 }
 0x578   :  { %v1240_v3 = vadd.f32 %v1239_v62, %v1211_v2 }
 0x579   :  { %1828 = vmatpush.bf16.msra.mxu3 %v2561_v58 }
 0x57a   :  { %v1252_v54 = vmax.f32 %v1240_v3, 0.0 }
 0x57c   :  { %v1260_v5 = vpack.c.bf16 %v1252_v54, %v1252_v54 }
 0x57d   :  { %v1213_v8 = vpop.f32.mrf.mxu1 }
 0x57e   :  { %v1276_v10 = vunpack.c.l.b16 %v1260_v5  ;;  %v1214_v11 = vadd.f32 %v2573_v47, %v1213_v8 }
 0x580   :  { %v1281_v13 = vpack.c.b16 %v1276_v10, %v1275_v9  ;;  %v1243_v15 = vadd.f32 %v1242_v6, %v1214_v11  ;;  %v2559_v11 = vld [vmem:[%s3186_s2 + $0x2e8] sm:$0xff] }
 0x582   :  { %1529 = vmatmul.bf16.gmra.mxu1 %v1281_v13  ;;  %v1253_v50 = vmax.f32 %v1243_v15, 0.0  ;;  %v2557_v15 = vld [vmem:[%s3186_s2 + $0x2d8] sm:$0xff] }
 0x584   :  { %v1261_v21 = vpack.c.bf16 %v1253_v50, %v1253_v50  ;;  %v2555_v50 = vld [vmem:[%s3186_s2 + $0x2c8] sm:$0xff] }
 0x585   :  { %v1215_v17 = vpop.f32.mrf.mxu1 }
 0x586   :  { %v1216_v18 = vadd.f32 %v2573_v47, %v1215_v17  ;;  %v1277_v23 = vunpack.c.l.b16 %v1261_v21  ;;  %v3011_v47 = vld [vmem:[%s3187_s1 + $0x8] sm:$0xff]  ;;  %v2556_v17 = vld [vmem:[%s3186_s2 + $0x2d0] sm:$0xff] }
 0x588   :  { %v1245_v20 = vadd.f32 %v1244_v19, %v1216_v18  ;;  %v2554_v19 = vld [vmem:[%s3186_s2 + $0x2c0] sm:$0xff] }
 0x58a   :  { %v1254_v22 = vmax.f32 %v1245_v20, 0.0  ;;  %v3080_v20 = vld [vmem:[%s3188_s3 + $0x4] ss:$0 sm:$0xff] }
 0x58c   :  { %v1262_v14 = vpack.c.bf16 %v1254_v22, %v1254_v22 }
 0x58e   :  { %v1278_v24 = vunpack.c.l.b16 %v1262_v14 }
 0x590   :  { %v1282_v27 = vpack.c.b16 %v1278_v24, %v1277_v23 }
 0x592   :  { %1291 = vmatpush.bf16.msrb.mxu0 %v1282_v27  ;;  %1534 = vmatmul.bf16.gmra.mxu1 %v1282_v27 }
 0x596   :  { %1292 = vmatpush.bf16.msrb.mxu0 %v1281_v13  ;;  %v2558_v13 = vld [vmem:[%s3186_s2 + $0x2e0] sm:$0xff] }
 0x59a   :  { %1293 = vmatpush.bf16.msrb.mxu0 %v1280_v60  ;;  %v2560_v60 = vld [vmem:[%s3186_s2 + $0x2f0] sm:$0xff] }
 0x59b   :  { %1829 = vmatpush.bf16.msra.mxu3 %v2560_v60 }
 0x59e   :  { %1294 = vmatpush.bf16.msrb.mxu0 %v1279_v37 }
 0x59f   :  { %1830 = vmatpush.bf16.msra.mxu3 %v2559_v11 }
 0x5a1   :  { %2260 = vmatmul.msk.bf16.vlgmr.msrb.gmra.mxu0 %vm88_vm0, %v3004_v28 }
 0x5a3   :  { %1831 = vmatpush.bf16.msra.mxu3 %v2558_v13 }
 0x5a7   :  { %1832 = vmatpush.bf16.msra.mxu3 %v2557_v15 }
 0x5ab   :  { %1833 = vmatpush.bf16.msra.mxu3 %v2556_v17 }
 0x5af   :  { %1834 = vmatpush.bf16.msra.mxu3 %v2555_v50 }
 0x5b1   :  { %2261 = vmatmul.msk.bf16.gmra.mxu0 %vm88_vm0, %v3011_v47 }
 0x5b3   :  { %1835 = vmatpush.bf16.msra.mxu3 %v2554_v19 }
 0x5c1   :  { %2262 = vmatmul.msk.bf16.gmra.mxu0 %vm88_vm0, %v3018_v29 }
 0x5d1   :  { %2263 = vmatmul.msk.bf16.gmra.mxu0 %vm88_vm0, %v3025_v32 }
 0x5df   :  { %v1520_v18 = vpop.f32.mrf.mxu1 }
 0x5e7   :  { %v1522_v21 = vpop.f32.mrf.mxu1 }
 0x5ef   :  { %v1525_v35 = vpop.f32.mrf.mxu1 }
 0x61e   :  { %v1296_v42 = vpop.f32.mrf.mxu0 }
 0x61f   :  { %v1316_v36 = vpack.c.bf16 %v1296_v42, %v1296_v42 }
 0x621   :  { %v1332_v39 = vunpack.c.l.b16 %v1316_v36 }
 0x626   :  { %v1298_v37 = vpop.f32.mrf.mxu0 }
 0x627   :  { %v1317_v38 = vpack.c.bf16 %v1298_v37, %v1298_v37 }
 0x629   :  { %v1333_v43 = vunpack.c.l.b16 %v1317_v38  ;;  %v1527_v38 = vpop.f32.mrf.mxu1 }
 0x62b   :  { %v1340_v44 = vpack.c.b16 %v1333_v43, %v1332_v39 }
 0x62d   :  { %1490 = vmatmul.bf16.vlgmr.msrb.gmra.mxu3 %v1340_v44 }
 0x62e   :  { %v1301_v61 = vpop.f32.mrf.mxu0 }
 0x62f   :  { %v1318_v45 = vpack.c.bf16 %v1301_v61, %v1301_v61 }
 0x631   :  { %v1334_v51 = vunpack.c.l.b16 %v1318_v45 }
 0x636   :  { %v1303_v46 = vpop.f32.mrf.mxu0 }
 0x637   :  { %v1319_v48 = vpack.c.bf16 %v1303_v46, %v1303_v46 }
 0x639   :  { %v1335_v53 = vunpack.c.l.b16 %v1319_v48 }
 0x63b   :  { %v1341_v55 = vpack.c.b16 %v1335_v53, %v1334_v51 }
 0x63d   :  { %1495 = vmatmul.bf16.gmra.mxu3 %v1341_v55  ;;  %v1530_v55 = vpop.f32.mrf.mxu1 }
 0x63e   :  { %v1306_v59 = vpop.f32.mrf.mxu0 }
 0x63f   :  { %v1320_v57 = vpack.c.bf16 %v1306_v59, %v1306_v59 }
 0x641   :  { %v1336_v0 = vunpack.c.l.b16 %v1320_v57 }
 0x646   :  { %v1308_v62 = vpop.f32.mrf.mxu0 }
 0x647   :  { %v1321_v63 = vpack.c.bf16 %v1308_v62, %v1308_v62 }
 0x649   :  { %v1337_v2 = vunpack.c.l.b16 %v1321_v63 }
 0x64b   :  { %v1342_v3 = vpack.c.b16 %v1337_v2, %v1336_v0 }
 0x64d   :  { %1500 = vmatmul.bf16.gmra.mxu3 %v1342_v3 }
 0x64e   :  { %v1311_v4 = vpop.f32.mrf.mxu0 }
 0x64f   :  { %v1322_v54 = vpack.c.bf16 %v1311_v4, %v1311_v4 }
 0x651   :  { %v1338_v8 = vunpack.c.l.b16 %v1322_v54  ;;  %v1532_v54 = vpop.f32.mrf.mxu1 }
 0x656   :  { %v1313_v5 = vpop.f32.mrf.mxu0 }
 0x657   :  { %v1323_v6 = vpack.c.bf16 %v1313_v5, %v1313_v5 }
 0x659   :  { %v1339_v9 = vunpack.c.l.b16 %v1323_v6  ;;  %v1535_v15 = vpop.f32.mrf.mxu1 }
 0x65b   :  { %v1343_v10 = vpack.c.b16 %v1339_v9, %v1338_v8 }
 0x65d   :  { %1505 = vmatmul.bf16.gmra.mxu3 %v1343_v10 }
 0x6b0   :  { %v1491_v22 = vpop.f32.mrf.mxu3 }
 0x6b1   :  { %v1492_v14 = vadd.f32 %v3080_v20, %v1491_v22 }
 0x6b3   :  { %v1521_v23 = vadd.f32 %v1520_v18, %v1492_v14 }
 0x6b5   :  { %v1540_v24 = vmax.f32 %v1521_v23, 0.0 }
 0x6b7   :  { %v1548_v27 = vadd.f32 %v1540_v24, %v2897_v26 }
 0x6b8   :  { %v1493_v40 = vpop.f32.mrf.mxu3 }
 0x6b9   :  { %v1556_v1 = vmul.f32 0.5, %v1548_v27  ;;  %v1494_v52 = vadd.f32 %v3080_v20, %v1493_v40 }
 0x6bb   :  { %1564 = vst [vmem:[%s3189_s5] sm:$0xff] %v1556_v1  ;;  %v1523_v16 = vadd.f32 %v1522_v21, %v1494_v52  ;;  %v1572_v42 = vpack.c.bf16 %v1556_v1, %v1556_v1  ;;  %v1537_v1 = vpop.f32.mrf.mxu1 }
 0x6bd   :  { %v1541_v33 = vmax.f32 %v1523_v16, 0.0  ;;  %v1588_v43 = vunpack.c.l.b16 %v1572_v42 }
 0x6bf   :  { %v1549_v34 = vadd.f32 %v1541_v33, %v2902_v31 }
 0x6c0   :  { %v1496_v41 = vpop.f32.mrf.mxu3 }
 0x6c1   :  { %v1557_v36 = vmul.f32 0.5, %v1549_v34  ;;  %v1497_v37 = vadd.f32 %v3080_v20, %v1496_v41 }
 0x6c3   :  { %1565 = vst [vmem:[%s3189_s5 + $0x8] sm:$0xff] %v1557_v36  ;;  %v1573_v26 = vpack.c.bf16 %v1557_v36, %v1557_v36  ;;  %v1526_v39 = vadd.f32 %v1525_v35, %v1497_v37  ;;  %v2552_v37 = vld [vmem:[%s3186_s2 + $0x2b0] sm:$0xff] }
 0x6c5   :  { %v1589_v44 = vunpack.c.l.b16 %v1573_v26  ;;  %v1542_v61 = vmax.f32 %v1526_v39, 0.0  ;;  %v2546_v26 = vld [vmem:[%s3186_s2 + $0x280] sm:$0xff] }
 0x6c7   :  { %v3093_v45 = vpack.c.b16 %v1589_v44, %v1588_v43  ;;  %v1550_v46 = vadd.f32 %v1542_v61, %v2909_v49 }
 0x6c8   :  { %v1498_v31 = vpop.f32.mrf.mxu3 }
 0x6c9   :  { %v1558_v48 = vmul.f32 0.5, %v1550_v46  ;;  %v1499_v51 = vadd.f32 %v3080_v20, %v1498_v31  ;;  %1836 = vmatmul.bf16.vlgmr.msra.gmra.mxu3 %v3093_v45 }
 0x6cb   :  { %1566 = vst [vmem:[%s3189_s5 + $0x10] sm:$0xff] %v1558_v48  ;;  %v1528_v53 = vadd.f32 %v1527_v38, %v1499_v51  ;;  %v1574_v49 = vpack.c.bf16 %v1558_v48, %v1558_v48  ;;  %v2547_v38 = vld [vmem:[%s3186_s2 + $0x288] sm:$0xff] }
 0x6cd   :  { %v1543_v58 = vmax.f32 %v1528_v53, 0.0  ;;  %v1590_v3 = vunpack.c.l.b16 %v1574_v49 }
 0x6cf   :  { %v1551_v59 = vadd.f32 %v1543_v58, %v2912_v56 }
 0x6d0   :  { %v1501_v60 = vpop.f32.mrf.mxu3 }
 0x6d1   :  { %v1559_v57 = vmul.f32 0.5, %v1551_v59  ;;  %v1502_v62 = vadd.f32 %v3080_v20, %v1501_v60 }
 0x6d3   :  { %1567 = vst [vmem:[%s3189_s5 + $0x18] sm:$0xff] %v1559_v57  ;;  %v1531_v63 = vadd.f32 %v1530_v55, %v1502_v62  ;;  %v1575_v0 = vpack.c.bf16 %v1559_v57, %v1559_v57 }
 0x6d5   :  { %v1544_v2 = vmax.f32 %v1531_v63, 0.0  ;;  %v1591_v4 = vunpack.c.l.b16 %v1575_v0 }
 0x6d7   :  { %v1552_v5 = vadd.f32 %v1544_v2, %v2921_v7  ;;  %v1597_v6 = vpack.c.b16 %v1591_v4, %v1590_v3 }
 0x6d8   :  { %v1503_v8 = vpop.f32.mrf.mxu3 }
 0x6d9   :  { %v1560_v56 = vmul.f32 0.5, %v1552_v5  ;;  %v1504_v9 = vadd.f32 %v3080_v20, %v1503_v8  ;;  %1841 = vmatmul.bf16.gmra.mxu3 %v1597_v6 }
 0x6db   :  { %1568 = vst [vmem:[%s3189_s5 + $0x20] sm:$0xff] %v1560_v56  ;;  %v1533_v10 = vadd.f32 %v1532_v54, %v1504_v9  ;;  %v1576_v7 = vpack.c.bf16 %v1560_v56, %v1560_v56 }
 0x6dd   :  { %v1545_v11 = vmax.f32 %v1533_v10, 0.0  ;;  %v1592_v14 = vunpack.c.l.b16 %v1576_v7 }
 0x6df   :  { %v1553_v13 = vadd.f32 %v1545_v11, %v2924_v12  ;;  %v2575_v11 = vld [vmem:[%s3188_s3 + $0x5] ss:$0 sm:$0xff] }
 0x6e0   :  { %v1506_v17 = vpop.f32.mrf.mxu3 }
 0x6e1   :  { %v1561_v50 = vmul.f32 0.5, %v1553_v13  ;;  %v1507_v18 = vadd.f32 %v3080_v20, %v1506_v17 }
 0x6e3   :  { %1569 = vst [vmem:[%s3189_s5 + $0x28] sm:$0xff] %v1561_v50  ;;  %v1536_v19 = vadd.f32 %v1535_v15, %v1507_v18  ;;  %v1577_v21 = vpack.c.bf16 %v1561_v50, %v1561_v50 }
 0x6e5   :  { %v1546_v22 = vmax.f32 %v1536_v19, 0.0  ;;  %v1593_v23 = vunpack.c.l.b16 %v1577_v21 }
 0x6e7   :  { %v1554_v24 = vadd.f32 %v1546_v22, %v2933_v25  ;;  %v1598_v27 = vpack.c.b16 %v1593_v23, %v1592_v14 }
 0x6e8   :  { %v1508_v35 = vpop.f32.mrf.mxu3 }
 0x6e9   :  { %v1562_v12 = vmul.f32 0.5, %v1554_v24  ;;  %v1509_v40 = vadd.f32 %v3080_v20, %v1508_v35  ;;  %1846 = vmatmul.bf16.gmra.mxu3 %v1598_v27 }
 0x6eb   :  { %1570 = vst [vmem:[%s3189_s5 + $0x30] sm:$0xff] %v1562_v12  ;;  %v1538_v52 = vadd.f32 %v1537_v1, %v1509_v40  ;;  %v1578_v34 = vpack.c.bf16 %v1562_v12, %v1562_v12 }
 0x6ed   :  { %v1547_v16 = vmax.f32 %v1538_v52, 0.0  ;;  %v1594_v42 = vunpack.c.l.b16 %v1578_v34 }
 0x6ef   :  { %v1555_v33 = vadd.f32 %v1547_v16, %v2938_v30  ;;  %v2553_v30 = vld [vmem:[%s3186_s2 + $0x2b8] sm:$0xff] }
 0x6f0   :  { %1799 = vmatpush.bf16.msra.mxu0 %v2553_v30 }
 0x6f1   :  { %v1563_v41 = vmul.f32 0.5, %v1555_v33 }
 0x6f3   :  { %1571 = vst [vmem:[%s3189_s5 + $0x38] sm:$0xff] %v1563_v41  ;;  %v1579_v25 = vpack.c.bf16 %v1563_v41, %v1563_v41 }
 0x6f4   :  { %1800 = vmatpush.bf16.msra.mxu0 %v2552_v37 }
 0x6f5   :  { %v1595_v36 = vunpack.c.l.b16 %v1579_v25 }
 0x6f7   :  { %v1599_v20 = vpack.c.b16 %v1595_v36, %v1594_v42 }
 0x6f9   :  { %1608 = vmatpush.bf16.msra.mxu2 %v1599_v20  ;;  %1851 = vmatmul.bf16.gmra.mxu3 %v1599_v20 }
 0x6fd   :  { %1609 = vmatpush.bf16.msra.mxu2 %v1598_v27 }
 0x701   :  { %1610 = vmatpush.bf16.msra.mxu2 %v1597_v6 }
 0x705   :  { %1611 = vmatpush.bf16.msra.mxu2 %v3093_v45 }
 0x708   :  { %2361 = vmatmul.msk.bf16.vlgmr.msra.gmra.mxu2 %vm88_vm0, %v3004_v28  ;;  %v2551_v28 = vld [vmem:[%s3186_s2 + $0x2a8] sm:$0xff] }
 0x709   :  { %1801 = vmatpush.bf16.msra.mxu0 %v2551_v28 }
 0x718   :  { %2362 = vmatmul.msk.bf16.gmra.mxu2 %vm88_vm0, %v3011_v47  ;;  %v2550_v47 = vld [vmem:[%s3186_s2 + $0x2a0] sm:$0xff] }
 0x719   :  { %1802 = vmatpush.bf16.msra.mxu0 %v2550_v47 }
 0x728   :  { %2363 = vmatmul.msk.bf16.gmra.mxu2 %vm88_vm0, %v3018_v29  ;;  %v2549_v29 = vld [vmem:[%s3186_s2 + $0x298] sm:$0xff] }
 0x729   :  { %1803 = vmatpush.bf16.msra.mxu0 %v2549_v29 }
 0x738   :  { %2364 = vmatmul.msk.bf16.gmra.mxu2 %vm88_vm0, %v3025_v32  ;;  %v2548_v32 = vld [vmem:[%s3186_s2 + $0x290] sm:$0xff] }
 0x739   :  { %1804 = vmatpush.bf16.msra.mxu0 %v2548_v32 }
 0x73d   :  { %1805 = vmatpush.bf16.msra.mxu0 %v2547_v38 }
 0x741   :  { %1806 = vmatpush.bf16.msra.mxu0 %v2546_v26 }
 0x74c   :  { %v1837_v10 = vpop.f32.mrf.mxu3 }
 0x754   :  { %v1839_v13 = vpop.f32.mrf.mxu3 }
 0x75c   :  { %v1842_v18 = vpop.f32.mrf.mxu3 }
 0x764   :  { %v1844_v23 = vpop.f32.mrf.mxu3 }
 0x76c   :  { %v1847_v40 = vpop.f32.mrf.mxu3 }
 0x774   :  { %v1849_v33 = vpop.f32.mrf.mxu3 }
 0x77c   :  { %v1852_v42 = vpop.f32.mrf.mxu3 }
 0x784   :  { %v1854_v47 = vpop.f32.mrf.mxu3 }
 0x78b   :  { %v1613_v39 = vpop.f32.mrf.mxu2 }
 0x78c   :  { %v1633_v43 = vpack.c.bf16 %v1613_v39, %v1613_v39 }
 0x78e   :  { %v1649_v45 = vunpack.c.l.b16 %v1633_v43 }
 0x793   :  { %v1615_v44 = vpop.f32.mrf.mxu2 }
 0x794   :  { %v1634_v61 = vpack.c.bf16 %v1615_v44, %v1615_v44 }
 0x796   :  { %v1650_v46 = vunpack.c.l.b16 %v1634_v61 }
 0x798   :  { %v1657_v31 = vpack.c.b16 %v1650_v46, %v1649_v45 }
 0x79a   :  { %1807 = vmatmul.bf16.vlgmr.msra.gmra.mxu0 %v1657_v31 }
 0x79b   :  { %v1618_v48 = vpop.f32.mrf.mxu2 }
 0x79c   :  { %v1635_v51 = vpack.c.bf16 %v1618_v48, %v1618_v48 }
 0x79e   :  { %v1651_v58 = vunpack.c.l.b16 %v1635_v51 }
 0x7a3   :  { %v1620_v53 = vpop.f32.mrf.mxu2 }
 0x7a4   :  { %v1636_v55 = vpack.c.bf16 %v1620_v53, %v1620_v53 }
 0x7a6   :  { %v1652_v59 = vunpack.c.l.b16 %v1636_v55 }
 0x7a8   :  { %v1658_v60 = vpack.c.b16 %v1652_v59, %v1651_v58 }
 0x7aa   :  { %1812 = vmatmul.bf16.gmra.mxu0 %v1658_v60 }
 0x7ab   :  { %v1623_v57 = vpop.f32.mrf.mxu2 }
 0x7ac   :  { %v1637_v62 = vpack.c.bf16 %v1623_v57, %v1623_v57 }
 0x7ae   :  { %v1653_v0 = vunpack.c.l.b16 %v1637_v62 }
 0x7b3   :  { %v1625_v49 = vpop.f32.mrf.mxu2 }
 0x7b4   :  { %v1638_v63 = vpack.c.bf16 %v1625_v49, %v1625_v49 }
 0x7b6   :  { %v1654_v2 = vunpack.c.l.b16 %v1638_v63 }
 0x7b8   :  { %v1659_v3 = vpack.c.b16 %v1654_v2, %v1653_v0 }
 0x7ba   :  { %1817 = vmatmul.bf16.gmra.mxu0 %v1659_v3 }
 0x7bb   :  { %v1628_v4 = vpop.f32.mrf.mxu2 }
 0x7bc   :  { %v1639_v54 = vpack.c.bf16 %v1628_v4, %v1628_v4 }
 0x7be   :  { %v1655_v8 = vunpack.c.l.b16 %v1639_v54 }
 0x7c3   :  { %v1630_v5 = vpop.f32.mrf.mxu2 }
 0x7c4   :  { %v1640_v6 = vpack.c.bf16 %v1630_v5, %v1630_v5 }
 0x7c6   :  { %v1656_v56 = vunpack.c.l.b16 %v1640_v6 }
 0x7c8   :  { %v1660_v9 = vpack.c.b16 %v1656_v56, %v1655_v8 }
 0x7ca   :  { %1822 = vmatmul.bf16.gmra.mxu0 %v1660_v9 }
 0x817   :  { %v1808_v15 = vpop.f32.mrf.mxu0 }
 0x818   :  { %v1809_v17 = vadd.f32 %v2575_v11, %v1808_v15 }
 0x81a   :  { %v1838_v50 = vadd.f32 %v1837_v10, %v1809_v17 }
 0x81c   :  { %1857 = vst [vmem:[%s3190_s4] sm:$0xff] %v1838_v50 }
 0x81f   :  { %v1810_v7 = vpop.f32.mrf.mxu0 }
 0x820   :  { %v1811_v19 = vadd.f32 %v2575_v11, %v1810_v7 }
 0x822   :  { %v1840_v21 = vadd.f32 %v1839_v13, %v1811_v19 }
 0x824   :  { %1858 = vst [vmem:[%s3190_s4 + $0x8] sm:$0xff] %v1840_v21 }
 0x827   :  { %v1813_v22 = vpop.f32.mrf.mxu0 }
 0x828   :  { %v1814_v14 = vadd.f32 %v2575_v11, %v1813_v22 }
 0x82a   :  { %v1843_v24 = vadd.f32 %v1842_v18, %v1814_v14 }
 0x82c   :  { %1859 = vst [vmem:[%s3190_s4 + $0x10] sm:$0xff] %v1843_v24 }
 0x82f   :  { %v1815_v27 = vpop.f32.mrf.mxu0 }
 0x830   :  { %v1816_v35 = vadd.f32 %v2575_v11, %v1815_v27 }
 0x832   :  { %v1845_v12 = vadd.f32 %v1844_v23, %v1816_v35 }
 0x834   :  { %1860 = vst [vmem:[%s3190_s4 + $0x18] sm:$0xff] %v1845_v12 }
 0x837   :  { %v1818_v1 = vpop.f32.mrf.mxu0 }
 0x838   :  { %v1819_v52 = vadd.f32 %v2575_v11, %v1818_v1 }
 0x83a   :  { %v1848_v16 = vadd.f32 %v1847_v40, %v1819_v52 }
 0x83c   :  { %1861 = vst [vmem:[%s3190_s4 + $0x20] sm:$0xff] %v1848_v16 }
 0x83f   :  { %v1820_v34 = vpop.f32.mrf.mxu0 }
 0x840   :  { %v1821_v41 = vadd.f32 %v2575_v11, %v1820_v34 }
 0x842   :  { %v1850_v25 = vadd.f32 %v1849_v33, %v1821_v41 }
 0x844   :  { %1862 = vst [vmem:[%s3190_s4 + $0x28] sm:$0xff] %v1850_v25 }
 0x847   :  { %v1823_v36 = vpop.f32.mrf.mxu0 }
 0x848   :  { %v1824_v20 = vadd.f32 %v2575_v11, %v1823_v36 }
 0x84a   :  { %v1853_v30 = vadd.f32 %v1852_v42, %v1824_v20 }
 0x84c   :  { %1863 = vst [vmem:[%s3190_s4 + $0x30] sm:$0xff] %v1853_v30 }
 0x84f   :  { %v1825_v37 = vpop.f32.mrf.mxu0 }
 0x850   :  { %v1826_v28 = vadd.f32 %v2575_v11, %v1825_v37 }
 0x852   :  { %v1855_v29 = vadd.f32 %v1854_v47, %v1826_v28 }
 0x854   :  { %1864 = vst [vmem:[%s3190_s4 + $0x38] sm:$0xff] %v1855_v29 }

</bundles_post_ra>
